<compile_context>
chip_gen: v7x
topology: tpu7x:2x2x1
jax: 0.10.0
libtpu: 0.0.40
codegen_flags: <defaults>
</compile_context>

<pallas_src>
import numpy as np

import jax
import jax.numpy as jnp
from jax.experimental import pallas as pl
from jax.experimental.pallas import tpu as pltpu

LANE = 128       # lane-width padding target for feature dims
GSUB = 16        # sublane padding for the (bf16) pooled-graph dim

# schedule step flags (packed into one int32 per step)
_F_FIRST = 1     # first block of a relation for this dst tile -> init agg
_F_AGG = 2       # step carries a nonzero adjacency block      -> matmul
_F_FIN = 4       # last step of a relation                     -> GIN MLP


def _round_up(n, m):
    return ((n + m - 1) // m) * m


def _pad2(a, rows, cols):
    out = jnp.zeros((rows, cols), a.dtype)
    return out.at[:a.shape[0], :a.shape[1]].set(a)


def _pad3(a, rows, cols):
    out = jnp.zeros((a.shape[0], rows, cols), a.dtype)
    return out.at[:, :a.shape[1], :a.shape[2]].set(a)


# ----------------------------------------------------------------------------
# RGINConv layer kernel.
#   out[i] = x[i] @ Wsl + bsl + sum_r MLP_r( (1+eps_r)*x[i] + sum_k A[r,i,k]@x[k] )
# Grid = (dst_tile i ["parallel"], packed (relation, src-block) step k ["arbitrary"]).
# ----------------------------------------------------------------------------
def _rgin_conv_kernel(s_rel_ref, s_blk_ref, s_src_ref, s_flag_ref,  # prefetch (SMEM)
                      eps_ref,                                      # SMEM (R,)
                      x_ref,                                        # (NP, DIP) bf16, resident
                      adj_ref,                                      # (tm, tk) bf16, streamed block
                      wsl_ref, bsl_ref,                             # self-loop Linear (bf16 / f32)
                      w1_ref, b1_ref, w2_ref, b2_ref,               # stacked per-relation MLPs, resident
                      out_ref,                                      # (tm, DOP) bf16 layer output
                      agg_ref, acc_ref):                            # fp32 scratch accumulators
    i = pl.program_id(0)
    k = pl.program_id(1)
    nk = pl.num_programs(1)
    idx = i * nk + k

    r = s_rel_ref[idx]
    flag = s_flag_ref[idx]

    tm = out_ref.shape[0]
    tk = adj_ref.shape[1]
    dst0 = pl.multiple_of(i * tm, tm)

    # Self-loop Linear initializes the per-dst-tile fp32 output accumulator.
    @pl.when(k == 0)
    def _():
        xdst = x_ref[pl.ds(dst0, tm), :]
        acc_ref[...] = (jnp.dot(xdst, wsl_ref[...],
                                preferred_element_type=jnp.float32)
                        + bsl_ref[...])

    # First block of relation r: seed the aggregation with the GIN self term.
    @pl.when((flag & _F_FIRST) != 0)
    def _():
        xdst = x_ref[pl.ds(dst0, tm), :]
        agg_ref[...] = (1.0 + eps_ref[r]) * xdst.astype(jnp.float32)

    # Block-sparse neighbor aggregation (only steps that carry real edges).
    @pl.when((flag & _F_AGG) != 0)
    def _():
        src0 = pl.multiple_of(s_src_ref[idx] * tk, tk)
        xsrc = x_ref[pl.ds(src0, tk), :]
        agg_ref[...] += jnp.dot(adj_ref[...], xsrc,
                                preferred_element_type=jnp.float32)

    # Last block of relation r: GIN MLP, accumulate into the layer output.
    @pl.when((flag & _F_FIN) != 0)
    def _():
        h = agg_ref[...].astype(jnp.bfloat16)
        t = jnp.dot(h, w1_ref[r], preferred_element_type=jnp.float32) + b1_ref[r]
        t = jnp.maximum(t, 0.0).astype(jnp.bfloat16)
        t = jnp.dot(t, w2_ref[r], preferred_element_type=jnp.float32) + b2_ref[r]
        acc_ref[...] += t

    # Last step for this dst tile: emit the bf16 layer output (feeds the next
    # layer / readout directly -- no wrapper-level cast pass).
    @pl.when(k == nk - 1)
    def _():
        out_ref[...] = acc_ref[...].astype(jnp.bfloat16)


def rgin_conv(x_bf16, adj_blocks, sched, eps, wsl, bsl, w1, b1, w2, b2,
              *, tile_nodes=128):
    NP, DIP = x_bf16.shape
    DOP = wsl.shape[1]
    R = w1.shape[0]
    tm = tk = tile_nodes
    ni = NP // tm
    maxk = sched["maxk"]

    def const2(i, k, *_):
        return (0, 0)

    def const3(i, k, *_):
        return (0, 0, 0)

    def out_map(i, k, *_):
        return (i, 0)

    def adj_map(i, k, s_rel, s_blk, s_src, s_flag):
        return (s_blk[i * maxk + k], 0, 0)

    grid_spec = pltpu.PrefetchScalarGridSpec(
        num_scalar_prefetch=4,
        grid=(ni, maxk),
        in_specs=[
            pl.BlockSpec(memory_space=pltpu.MemorySpace.SMEM),   # eps (R,)
            pl.BlockSpec((NP, DIP), const2),                     # x bf16, resident
            # TODO(synk): on v5e, pipeline_mode=pl.Buffered(3) on this spec
            # hides the data-dependent adjacency-block DMA latency better.
            pl.BlockSpec((pl.Squeezed(), tm, tk), adj_map),      # adj block bf16
            pl.BlockSpec((DIP, DOP), const2),                    # Wsl bf16, resident
            pl.BlockSpec((1, DOP), const2),                      # bsl fp32
            pl.BlockSpec((R, DIP, DOP), const3),                 # W1 bf16, resident
            pl.BlockSpec((R, 1, DOP), const3),                   # b1 fp32
            pl.BlockSpec((R, DOP, DOP), const3),                 # W2 bf16, resident
            pl.BlockSpec((R, 1, DOP), const3),                   # b2 fp32
        ],
        out_specs=pl.BlockSpec((tm, DOP), out_map),
        scratch_shapes=[pltpu.VMEM((tm, DIP), jnp.float32),      # relation agg
                        pltpu.VMEM((tm, DOP), jnp.float32)],     # layer out acc
    )
    return pl.pallas_call(
        _rgin_conv_kernel,
        out_shape=jax.ShapeDtypeStruct((NP, DOP), jnp.bfloat16),
        grid_spec=grid_spec,
        compiler_params=pltpu.CompilerParams(
            dimension_semantics=("parallel", "arbitrary")),
    )(sched["rel"], sched["blk"], sched["src"], sched["flag"],
      eps, x_bf16, adj_blocks, wsl, bsl, w1, b1, w2, b2)


# ----------------------------------------------------------------------------
# Readout: mean-pool (bf16 pooling-matrix matmul, tiled over nodes) + lin1 +
# ReLU + lin2.  Pooled accumulator resident across the node-tile grid axis.
# ----------------------------------------------------------------------------
def _readout_kernel(p_ref, x_ref, w1_ref, b1_ref, w2_ref, b2_ref,
                    out_ref, acc_ref):
    n = pl.program_id(0)

    @pl.when(n == 0)
    def _():
        acc_ref[...] = jnp.zeros_like(acc_ref)

    acc_ref[...] += jnp.dot(p_ref[...], x_ref[...],
                            preferred_element_type=jnp.float32)

    @pl.when(n == pl.num_programs(0) - 1)
    def _():
        h = jnp.dot(acc_ref[...].astype(jnp.bfloat16), w1_ref[...],
                    preferred_element_type=jnp.float32) + b1_ref[...]
        h = jnp.maximum(h, 0.0).astype(jnp.bfloat16)
        # TODO(synk): F.dropout(p=0.5) is identity in eval/inference mode.
        out_ref[...] = (jnp.dot(h, w2_ref[...],
                                preferred_element_type=jnp.float32)
                        + b2_ref[...])


def readout(pool, x, w1, b1, w2, b2, *, tile_nodes=128):
    GP, NP = pool.shape
    HP = x.shape[1]
    CP = w2.shape[1]
    return pl.pallas_call(
        _readout_kernel,
        out_shape=jax.ShapeDtypeStruct((GP, CP), jnp.float32),
        grid=(NP // tile_nodes,),
        in_specs=[
            pl.BlockSpec((GP, tile_nodes), lambda n: (0, n)),
            pl.BlockSpec((tile_nodes, HP), lambda n: (n, 0)),
            pl.BlockSpec((HP, HP), lambda n: (0, 0)),
            pl.BlockSpec((1, HP), lambda n: (0, 0)),
            pl.BlockSpec((HP, CP), lambda n: (0, 0)),
            pl.BlockSpec((1, CP), lambda n: (0, 0)),
        ],
        out_specs=pl.BlockSpec((GP, CP), lambda n: (0, 0)),
        scratch_shapes=[pltpu.VMEM((GP, HP), jnp.float32)],
        compiler_params=pltpu.CompilerParams(
            dimension_semantics=("arbitrary",)),
    )(pool, x, w1, b1, w2, b2)


# ----------------------------------------------------------------------------
# Host-side (once per graph) preprocessing: compacted bf16 adjacency blocks +
# packed per-dst-tile (relation, src-tile) schedule for the conv kernel.
# Hoisted out of rgin_forward so the forward itself stays traceable.
# ----------------------------------------------------------------------------
def build_graph_blocks(edge_index, edge_type, num_relations, num_nodes,
                       tile_nodes=128):
    ei = np.asarray(jax.device_get(edge_index)).astype(np.int64)
    et = np.asarray(jax.device_get(edge_type)).astype(np.int64)
    R = num_relations
    tn = tile_nodes
    NP = _round_up(max(num_nodes, tn), tn)
    ni = NP // tn

    src, dst = ei[0], ei[1]
    i_t, j_t = dst // tn, src // tn
    a, b = dst % tn, src % tn
    keys = (et * ni + i_t) * ni + j_t
    if keys.size:
        uniq, inv = np.unique(keys, return_inverse=True)
    else:
        uniq = np.zeros((0,), np.int64)
        inv = np.zeros((0,), np.int64)
    nb = int(uniq.size)
    blocks = np.zeros((max(nb, 1), tn, tn), np.float32)
    if keys.size:
        np.add.at(blocks, (inv, a, b), 1.0)
    # bf16 stores integer edge multiplicities exactly only up to 256.
    assert blocks.max() <= 256.0, "edge multiplicity too large for bf16 adjacency"

    rel_of = uniq // (ni * ni)
    dti_of = (uniq // ni) % ni
    stj_of = uniq % ni
    groups = {}
    for bid in range(nb):
        groups.setdefault((int(rel_of[bid]), int(dti_of[bid])), []).append(
            (bid, int(stj_of[bid])))

    # Packed schedule: per dst tile, sum_r max(nnz_blocks(r), 1) steps.
    # TODO(synk): on v7x, interleave heavy dst tiles across the two TensorCores.
    steps = []
    for i in range(ni):
        tile_steps = []
        prev_blk = 0
        for r in range(R):
            lst = groups.get((r, i), [])
            if not lst:
                tile_steps.append((r, prev_blk, 0, _F_FIRST | _F_FIN))
            else:
                for n, (bid, j) in enumerate(lst):
                    fl = _F_AGG
                    if n == 0:
                        fl |= _F_FIRST
                    if n == len(lst) - 1:
                        fl |= _F_FIN
                    tile_steps.append((r, bid, j, fl))
                    prev_blk = bid
        steps.append(tile_steps)

    maxk = max(1, max(len(s) for s in steps))
    s_rel = np.zeros((ni, maxk), np.int32)
    s_blk = np.zeros((ni, maxk), np.int32)
    s_src = np.zeros((ni, maxk), np.int32)
    s_flag = np.zeros((ni, maxk), np.int32)
    for i in range(ni):
        prev_blk = steps[i][-1][1] if steps[i] else 0
        for k, (r, bid, j, fl) in enumerate(steps[i]):
            s_rel[i, k], s_blk[i, k], s_src[i, k], s_flag[i, k] = r, bid, j, fl
        s_blk[i, len(steps[i]):] = prev_blk  # padding steps: no re-DMA, no-op

    return dict(
        NP=NP, ni=ni, maxk=maxk, tile_nodes=tn,
        adj_blocks=jnp.asarray(blocks, jnp.bfloat16),
        rel=jnp.asarray(s_rel.reshape(-1)),
        blk=jnp.asarray(s_blk.reshape(-1)),
        src=jnp.asarray(s_src.reshape(-1)),
        flag=jnp.asarray(s_flag.reshape(-1)),
    )


# ----------------------------------------------------------------------------
# Parameter initialization (deterministic, PyTorch-Linear-style uniform).
# ----------------------------------------------------------------------------
def _init_linear(key, din, dout):
    k1, k2 = jax.random.split(key)
    bound = 1.0 / (din ** 0.5)
    w = jax.random.uniform(k1, (din, dout), jnp.float32, -bound, bound)
    b = jax.random.uniform(k2, (1, dout), jnp.float32, -bound, bound)
    return w, b


def _init_rgin_conv(key, din, dout, num_relations, eps=0.0):
    keys = jax.random.split(key, 2 * num_relations + 1)
    wsl, bsl = _init_linear(keys[0], din, dout)
    w1s, b1s, w2s, b2s = [], [], [], []
    for r in range(num_relations):
        w1, b1 = _init_linear(keys[1 + 2 * r], din, dout)
        w2, b2 = _init_linear(keys[2 + 2 * r], dout, dout)
        w1s.append(w1); b1s.append(b1); w2s.append(w2); b2s.append(b2)
    return dict(
        eps=jnp.full((num_relations,), eps, jnp.float32),
        wsl=wsl, bsl=bsl,
        w1=jnp.stack(w1s), b1=jnp.stack(b1s),
        w2=jnp.stack(w2s), b2=jnp.stack(b2s))


def init_rgin_params(key, num_features, num_classes, num_layers, hidden_dim,
                     num_relations):
    keys = jax.random.split(key, num_layers + 2)
    convs = [_init_rgin_conv(keys[0], num_features, hidden_dim, num_relations)]
    for l in range(num_layers - 1):
        convs.append(_init_rgin_conv(keys[1 + l], hidden_dim, hidden_dim,
                                     num_relations))
    lin1_w, lin1_b = _init_linear(keys[num_layers], hidden_dim, hidden_dim)
    lin2_w, lin2_b = _init_linear(keys[num_layers + 1], hidden_dim, num_classes)
    return dict(convs=convs, lin1_w=lin1_w, lin1_b=lin1_b,
                lin2_w=lin2_w, lin2_b=lin2_b)


# ----------------------------------------------------------------------------
# Full RGIN forward (pure JAX glue + Pallas kernels; traceable -- graph
# metadata is built separately on host).
# ----------------------------------------------------------------------------
def rgin_forward(params, x, graph, batch, num_graphs):
    tile_nodes = graph["tile_nodes"]
    NP = graph["NP"]
    F = x.shape[1]
    H = params["lin1_w"].shape[0]
    C = params["lin2_w"].shape[1]
    HP = _round_up(H, LANE)
    CP = _round_up(C, LANE)
    GP = _round_up(num_graphs, GSUB)

    h = _pad2(x, NP, _round_up(F, LANE)).astype(jnp.bfloat16)
    for layer in params["convs"]:
        din, dout = layer["wsl"].shape
        DIP, DOP = _round_up(din, LANE), _round_up(dout, LANE)
        h = rgin_conv(
            h, graph["adj_blocks"], graph, layer["eps"],
            _pad2(layer["wsl"], DIP, DOP).astype(jnp.bfloat16),
            _pad2(layer["bsl"], 1, DOP),
            _pad3(layer["w1"], DIP, DOP).astype(jnp.bfloat16),
            _pad3(layer["b1"], 1, DOP),
            _pad3(layer["w2"], DOP, DOP).astype(jnp.bfloat16),
            _pad3(layer["b2"], 1, DOP),
            tile_nodes=tile_nodes)

    # Mean pooling as a [GP, NP] matrix (padded graph rows / node cols are 0).
    onehot = (batch[None, :] == jnp.arange(num_graphs)[:, None]).astype(jnp.float32)
    counts = jnp.maximum(onehot.sum(axis=1, keepdims=True), 1.0)
    pool = _pad2(onehot / counts, GP, NP).astype(jnp.bfloat16)

    out = readout(
        pool, h,
        _pad2(params["lin1_w"], HP, HP).astype(jnp.bfloat16),
        _pad2(params["lin1_b"], 1, HP),
        _pad2(params["lin2_w"], HP, CP).astype(jnp.bfloat16),
        _pad2(params["lin2_b"], 1, CP),
        tile_nodes=tile_nodes)
    return out[:num_graphs, :C]


# ----------------------------------------------------------------------------
# Pure-JAX reference mirroring the kernel's bf16 matmul inputs exactly.
# ----------------------------------------------------------------------------
def rgin_reference(params, x, edge_index, edge_type, batch, num_graphs,
                   num_relations):
    f32 = jnp.float32

    def b16(a):
        return a.astype(jnp.bfloat16).astype(f32)

    N = x.shape[0]
    src, dst = edge_index[0], edge_index[1]
    adj = jnp.zeros((num_relations, N, N), f32)
    adj = adj.at[edge_type, dst, src].add(1.0)
    adj = b16(adj)

    h = b16(x)
    for layer in params["convs"]:
        out = h @ b16(layer["wsl"]) + layer["bsl"]
        for r in range(num_relations):
            agg = (1.0 + layer["eps"][r]) * h + adj[r] @ h
            t = b16(agg) @ b16(layer["w1"][r]) + layer["b1"][r]
            t = b16(jnp.maximum(t, 0.0)) @ b16(layer["w2"][r]) + layer["b2"][r]
            out = out + t
        h = b16(out)

    onehot = (batch[None, :] == jnp.arange(num_graphs)[:, None]).astype(f32)
    pool = onehot / jnp.maximum(onehot.sum(1, keepdims=True), 1.0)
    pooled = b16(pool) @ h
    z = b16(pooled) @ b16(params["lin1_w"]) + params["lin1_b"]
    z = b16(jnp.maximum(z, 0.0))
    return z @ b16(params["lin2_w"]) + params["lin2_b"]


if __name__ == "__main__":
    # Small, deterministic problem (node count > 1 tile to exercise tiling).
    num_features, hidden_dim, num_classes = 20, 64, 5
    num_layers, num_relations = 2, 3
    N, E, num_graphs = 200, 500, 3
    tile_nodes = 128

    key = jax.random.PRNGKey(0)
    k_x, k_src, k_dst, k_rel, k_par = jax.random.split(key, 5)

    x = jax.random.normal(k_x, (N, num_features), jnp.float32)
    src = jax.random.randint(k_src, (E,), 0, N, jnp.int32)
    dst = jax.random.randint(k_dst, (E,), 0, N, jnp.int32)
    edge_index = jnp.stack([src, dst], axis=0)                  # [2, E]
    edge_type = jax.random.randint(k_rel, (E,), 0, num_relations, jnp.int32)
    batch = jnp.concatenate([jnp.zeros(70, jnp.int32),
                             jnp.ones(65, jnp.int32),
                             jnp.full((65,), 2, jnp.int32)])    # [N]

    params = init_rgin_params(k_par, num_features, num_classes, num_layers,
                              hidden_dim, num_relations)

    # Once-per-graph host preprocessing (compacted adjacency + block schedule).
    graph = build_graph_blocks(edge_index, edge_type, num_relations, N,
                               tile_nodes=tile_nodes)

    out = rgin_forward(params, x, graph, batch, num_graphs)
    out = jax.block_until_ready(out)

    ref = rgin_reference(params, x, edge_index, edge_type, batch, num_graphs,
                         num_relations)

    assert out.shape == (num_graphs, num_classes)
    assert bool(jnp.all(jnp.isfinite(out)))
    assert bool(jnp.allclose(out, ref, rtol=2e-2, atol=2e-2)), (
        f"max abs err {float(jnp.max(jnp.abs(out - ref)))}")
    print("KERNEL_OK")
</pallas_src>

<mosaic_0001>
module attributes {stable_mosaic.version = 11 : i64} {
  func.func @_rgin_conv_kernel(%arg0: i32, %arg1: i32, %arg2: memref<12xi32, #tpu.memory_space<smem>>, %arg3: memref<12xi32, #tpu.memory_space<smem>>, %arg4: memref<12xi32, #tpu.memory_space<smem>>, %arg5: memref<12xi32, #tpu.memory_space<smem>>, %arg6: memref<3xf32, #tpu.memory_space<smem>>, %arg7: memref<256x128xbf16, #tpu.memory_space<vmem>>, %arg8: memref<1x128x128xbf16, #tpu.memory_space<vmem>>, %arg9: memref<128x128xbf16, #tpu.memory_space<vmem>>, %arg10: memref<1x128xf32, #tpu.memory_space<vmem>>, %arg11: memref<3x128x128xbf16, #tpu.memory_space<vmem>>, %arg12: memref<3x1x128xf32, #tpu.memory_space<vmem>>, %arg13: memref<3x128x128xbf16, #tpu.memory_space<vmem>>, %arg14: memref<3x1x128xf32, #tpu.memory_space<vmem>>, %arg15: memref<128x128xbf16, #tpu.memory_space<vmem>>, %arg16: memref<128x128xf32, #tpu.memory_space<vmem>>, %arg17: memref<128x128xf32, #tpu.memory_space<vmem>>) attributes {dimension_semantics = [#tpu.dimension_semantics<parallel>, #tpu.dimension_semantics<arbitrary>], iteration_bounds = array<i64: 2, 6>, scalar_prefetch = 4 : i64, scratch_operands = 2 : i64, tpu.core_type = #tpu.core_type<tc>, window_params = [{transform_indices = @transform_0, window_bounds = array<i64: 3>}, {pipeline_mode = #tpu.pipeline_mode<synchronous>, transform_indices = @transform_1, window_bounds = array<i64: 256, 128>}, {transform_indices = @transform_2, window_bounds = array<i64: 1, 128, 128>}, {pipeline_mode = #tpu.pipeline_mode<synchronous>, transform_indices = @transform_3, window_bounds = array<i64: 128, 128>}, {pipeline_mode = #tpu.pipeline_mode<synchronous>, transform_indices = @transform_4, window_bounds = array<i64: 1, 128>}, {pipeline_mode = #tpu.pipeline_mode<synchronous>, transform_indices = @transform_5, window_bounds = array<i64: 3, 128, 128>}, {pipeline_mode = #tpu.pipeline_mode<synchronous>, transform_indices = @transform_6, window_bounds = array<i64: 3, 1, 128>}, {pipeline_mode = #tpu.pipeline_mode<synchronous>, transform_indices = @transform_7, window_bounds = array<i64: 3, 128, 128>}, {pipeline_mode = #tpu.pipeline_mode<synchronous>, transform_indices = @transform_8, window_bounds = array<i64: 3, 1, 128>}, {transform_indices = @transform_9, window_bounds = array<i64: 128, 128>}]} {
    %c6_i32 = arith.constant 6 : i32
    %0 = arith.muli %arg0, %c6_i32 : i32
    %1 = arith.addi %0, %arg1 : i32
    %2 = arith.index_cast %1 : i32 to index
    %3 = memref.load %arg2[%2] : memref<12xi32, #tpu.memory_space<smem>>
    %4 = arith.index_cast %1 : i32 to index
    %5 = memref.load %arg5[%4] : memref<12xi32, #tpu.memory_space<smem>>
    %c128_i32 = arith.constant 128 : i32
    %6 = arith.muli %arg0, %c128_i32 : i32
    %7 = tpu.assume_multiple %6, 128 : i32
    %c0_i32 = arith.constant 0 : i32
    %8 = arith.cmpi eq, %arg1, %c0_i32 : i32
    %9 = arith.extui %8 : i1 to i32
    %c0_i32_0 = arith.constant 0 : i32
    %10 = arith.cmpi ne, %9, %c0_i32_0 : i32
    scf.if %10 {
      %26 = arith.index_cast %7 : i32 to index
      %c0 = arith.constant 0 : index
      %27 = vector.load %arg7[%26, %c0] : memref<256x128xbf16, #tpu.memory_space<vmem>>, vector<128x128xbf16>
      %c0_8 = arith.constant 0 : index
      %c0_9 = arith.constant 0 : index
      %28 = vector.load %arg9[%c0_8, %c0_9] : memref<128x128xbf16, #tpu.memory_space<vmem>>, vector<128x128xbf16>
      %cst = arith.constant dense<0.000000e+00> : vector<128x128xf32>
      %29 = tpu.matmul %27, %28, %cst {dimension_numbers = #tpu.dot_dimension_numbers<[1], [0], [0], [1], [0, 0, 1, 1], [], []>} : vector<128x128xbf16>, vector<128x128xbf16>, vector<128x128xf32> -> vector<128x128xf32>
      %c0_10 = arith.constant 0 : index
      %c0_11 = arith.constant 0 : index
      %30 = vector.load %arg10[%c0_10, %c0_11] : memref<1x128xf32, #tpu.memory_space<vmem>>, vector<1x128xf32>
      %31 = vector.broadcast %30 : vector<1x128xf32> to vector<128x128xf32>
      %32 = arith.addf %29, %31 : vector<128x128xf32>
      %c0_12 = arith.constant 0 : index
      %c0_13 = arith.constant 0 : index
      %33 = vector.load %arg17[%c0_12, %c0_13] : memref<128x128xf32, #tpu.memory_space<vmem>>, vector<128x128xf32>
      tpu.vector_store %arg17[%c0_12, %c0_13], %32 {strides = array<i32>} : memref<128x128xf32, #tpu.memory_space<vmem>>, vector<128x128xf32>,
    } else {
    }
    %c1_i32 = arith.constant 1 : i32
    %11 = arith.andi %5, %c1_i32 : i32
    %c0_i32_1 = arith.constant 0 : i32
    %12 = arith.cmpi ne, %11, %c0_i32_1 : i32
    %13 = arith.extui %12 : i1 to i32
    %c0_i32_2 = arith.constant 0 : i32
    %14 = arith.cmpi ne, %13, %c0_i32_2 : i32
    scf.if %14 {
      %26 = arith.index_cast %7 : i32 to index
      %c0 = arith.constant 0 : index
      %27 = vector.load %arg7[%26, %c0] : memref<256x128xbf16, #tpu.memory_space<vmem>>, vector<128x128xbf16>
      %28 = arith.index_cast %3 : i32 to index
      %29 = memref.load %arg6[%28] : memref<3xf32, #tpu.memory_space<smem>>
      %cst = arith.constant 1.000000e+00 : f32
      %30 = arith.addf %cst, %29 : f32
      %31 = arith.extf %27 : vector<128x128xbf16> to vector<128x128xf32>
      %32 = vector.broadcast %30 : f32 to vector<128x128xf32>
      %33 = arith.mulf %32, %31 : vector<128x128xf32>
      %c0_8 = arith.constant 0 : index
      %c0_9 = arith.constant 0 : index
      %34 = vector.load %arg16[%c0_8, %c0_9] : memref<128x128xf32, #tpu.memory_space<vmem>>, vector<128x128xf32>
      tpu.vector_store %arg16[%c0_8, %c0_9], %33 {strides = array<i32>} : memref<128x128xf32, #tpu.memory_space<vmem>>, vector<128x128xf32>,
    } else {
    }
    %c2_i32 = arith.constant 2 : i32
    %15 = arith.andi %5, %c2_i32 : i32
    %c0_i32_3 = arith.constant 0 : i32
    %16 = arith.cmpi ne, %15, %c0_i32_3 : i32
    %17 = arith.extui %16 : i1 to i32
    %c0_i32_4 = arith.constant 0 : i32
    %18 = arith.cmpi ne, %17, %c0_i32_4 : i32
    scf.if %18 {
      %26 = arith.index_cast %1 : i32 to index
      %27 = memref.load %arg4[%26] : memref<12xi32, #tpu.memory_space<smem>>
      %c128_i32_8 = arith.constant 128 : i32
      %28 = arith.muli %27, %c128_i32_8 : i32
      %29 = tpu.assume_multiple %28, 128 : i32
      %30 = arith.index_cast %29 : i32 to index
      %c0 = arith.constant 0 : index
      %31 = vector.load %arg7[%30, %c0] : memref<256x128xbf16, #tpu.memory_space<vmem>>, vector<128x128xbf16>
      %c0_9 = arith.constant 0 : index
      %c0_10 = arith.constant 0 : index
      %32 = vector.load %arg16[%c0_9, %c0_10] : memref<128x128xf32, #tpu.memory_space<vmem>>, vector<128x128xf32>
      %c0_11 = arith.constant 0 : index
      %c0_12 = arith.constant 0 : index
      %c0_13 = arith.constant 0 : index
      %33 = vector.load %arg8[%c0_11, %c0_12, %c0_13] : memref<1x128x128xbf16, #tpu.memory_space<vmem>>, vector<1x128x128xbf16>
      %34 = vector.shape_cast %33 : vector<1x128x128xbf16> to vector<128x128xbf16>
      %cst = arith.constant dense<0.000000e+00> : vector<128x128xf32>
      %35 = tpu.matmul %34, %31, %cst {dimension_numbers = #tpu.dot_dimension_numbers<[1], [0], [0], [1], [0, 0, 1, 1], [], []>} : vector<128x128xbf16>, vector<128x128xbf16>, vector<128x128xf32> -> vector<128x128xf32>
      %36 = arith.addf %32, %35 : vector<128x128xf32>
      %c0_14 = arith.constant 0 : index
      %c0_15 = arith.constant 0 : index
      %37 = vector.load %arg16[%c0_14, %c0_15] : memref<128x128xf32, #tpu.memory_space<vmem>>, vector<128x128xf32>
      tpu.vector_store %arg16[%c0_14, %c0_15], %36 {strides = array<i32>} : memref<128x128xf32, #tpu.memory_space<vmem>>, vector<128x128xf32>,
    } else {
    }
    %c4_i32 = arith.constant 4 : i32
    %19 = arith.andi %5, %c4_i32 : i32
    %c0_i32_5 = arith.constant 0 : i32
    %20 = arith.cmpi ne, %19, %c0_i32_5 : i32
    %21 = arith.extui %20 : i1 to i32
    %c0_i32_6 = arith.constant 0 : i32
    %22 = arith.cmpi ne, %21, %c0_i32_6 : i32
    scf.if %22 {
      %c0 = arith.constant 0 : index
      %c0_8 = arith.constant 0 : index
      %26 = vector.load %arg16[%c0, %c0_8] : memref<128x128xf32, #tpu.memory_space<vmem>>, vector<128x128xf32>
      %27 = arith.truncf %26 : vector<128x128xf32> to vector<128x128xbf16>
      %28 = arith.index_cast %3 : i32 to index
      %c0_9 = arith.constant 0 : index
      %c0_10 = arith.constant 0 : index
      %29 = vector.load %arg11[%28, %c0_9, %c0_10] : memref<3x128x128xbf16, #tpu.memory_space<vmem>>, vector<1x128x128xbf16>
      %30 = vector.shape_cast %29 : vector<1x128x128xbf16> to vector<128x128xbf16>
      %cst = arith.constant dense<0.000000e+00> : vector<128x128xf32>
      %31 = tpu.matmul %27, %30, %cst {dimension_numbers = #tpu.dot_dimension_numbers<[1], [0], [0], [1], [0, 0, 1, 1], [], []>} : vector<128x128xbf16>, vector<128x128xbf16>, vector<128x128xf32> -> vector<128x128xf32>
      %32 = arith.index_cast %3 : i32 to index
      %c0_11 = arith.constant 0 : index
      %c0_12 = arith.constant 0 : index
      %33 = vector.load %arg12[%32, %c0_11, %c0_12] : memref<3x1x128xf32, #tpu.memory_space<vmem>>, vector<1x1x128xf32>
      %34 = vector.shape_cast %33 : vector<1x1x128xf32> to vector<1x128xf32>
      %35 = vector.broadcast %34 : vector<1x128xf32> to vector<128x128xf32>
      %36 = arith.addf %31, %35 : vector<128x128xf32>
      %cst_13 = arith.constant 0.000000e+00 : f32
      %37 = vector.broadcast %cst_13 : f32 to vector<128x128xf32>
      %38 = arith.maximumf %36, %37 : vector<128x128xf32>
      %39 = arith.truncf %38 : vector<128x128xf32> to vector<128x128xbf16>
      %40 = arith.index_cast %3 : i32 to index
      %c0_14 = arith.constant 0 : index
      %c0_15 = arith.constant 0 : index
      %41 = vector.load %arg13[%40, %c0_14, %c0_15] : memref<3x128x128xbf16, #tpu.memory_space<vmem>>, vector<1x128x128xbf16>
      %42 = vector.shape_cast %41 : vector<1x128x128xbf16> to vector<128x128xbf16>
      %cst_16 = arith.constant dense<0.000000e+00> : vector<128x128xf32>
      %43 = tpu.matmul %39, %42, %cst_16 {dimension_numbers = #tpu.dot_dimension_numbers<[1], [0], [0], [1], [0, 0, 1, 1], [], []>} : vector<128x128xbf16>, vector<128x128xbf16>, vector<128x128xf32> -> vector<128x128xf32>
      %44 = arith.index_cast %3 : i32 to index
      %c0_17 = arith.constant 0 : index
      %c0_18 = arith.constant 0 : index
      %45 = vector.load %arg14[%44, %c0_17, %c0_18] : memref<3x1x128xf32, #tpu.memory_space<vmem>>, vector<1x1x128xf32>
      %46 = vector.shape_cast %45 : vector<1x1x128xf32> to vector<1x128xf32>
      %47 = vector.broadcast %46 : vector<1x128xf32> to vector<128x128xf32>
      %48 = arith.addf %43, %47 : vector<128x128xf32>
      %c0_19 = arith.constant 0 : index
      %c0_20 = arith.constant 0 : index
      %49 = vector.load %arg17[%c0_19, %c0_20] : memref<128x128xf32, #tpu.memory_space<vmem>>, vector<128x128xf32>
      %50 = arith.addf %49, %48 : vector<128x128xf32>
      %c0_21 = arith.constant 0 : index
      %c0_22 = arith.constant 0 : index
      %51 = vector.load %arg17[%c0_21, %c0_22] : memref<128x128xf32, #tpu.memory_space<vmem>>, vector<128x128xf32>
      tpu.vector_store %arg17[%c0_21, %c0_22], %50 {strides = array<i32>} : memref<128x128xf32, #tpu.memory_space<vmem>>, vector<128x128xf32>,
    } else {
    }
    %c5_i32 = arith.constant 5 : i32
    %23 = arith.cmpi eq, %arg1, %c5_i32 : i32
    %24 = arith.extui %23 : i1 to i32
    %c0_i32_7 = arith.constant 0 : i32
    %25 = arith.cmpi ne, %24, %c0_i32_7 : i32
    scf.if %25 {
      %c0 = arith.constant 0 : index
      %c0_8 = arith.constant 0 : index
      %26 = vector.load %arg17[%c0, %c0_8] : memref<128x128xf32, #tpu.memory_space<vmem>>, vector<128x128xf32>
      %27 = arith.truncf %26 : vector<128x128xf32> to vector<128x128xbf16>
      %c0_9 = arith.constant 0 : index
      %c0_10 = arith.constant 0 : index
      %28 = vector.load %arg15[%c0_9, %c0_10] : memref<128x128xbf16, #tpu.memory_space<vmem>>, vector<128x128xbf16>
      tpu.vector_store %arg15[%c0_9, %c0_10], %27 {strides = array<i32>} : memref<128x128xbf16, #tpu.memory_space<vmem>>, vector<128x128xbf16>,
    } else {
    }
    return
  }
  func.func @transform_0(%arg0: i32, %arg1: i32, %arg2: memref<12xi32, #tpu.memory_space<smem>>, %arg3: memref<12xi32, #tpu.memory_space<smem>>, %arg4: memref<12xi32, #tpu.memory_space<smem>>, %arg5: memref<12xi32, #tpu.memory_space<smem>>) -> i32 {
    %c0_i32 = arith.constant 0 : i32
    %c0_i32_0 = arith.constant 0 : i32
    return %c0_i32 : i32
  }
  func.func @transform_1(%arg0: i32, %arg1: i32, %arg2: memref<12xi32, #tpu.memory_space<smem>>, %arg3: memref<12xi32, #tpu.memory_space<smem>>, %arg4: memref<12xi32, #tpu.memory_space<smem>>, %arg5: memref<12xi32, #tpu.memory_space<smem>>) -> (i32, i32) {
    %c0_i32 = arith.constant 0 : i32
    %c0_i32_0 = arith.constant 0 : i32
    %c0_i32_1 = arith.constant 0 : i32
    return %c0_i32, %c0_i32_0 : i32, i32
  }
  func.func @transform_2(%arg0: i32, %arg1: i32, %arg2: memref<12xi32, #tpu.memory_space<smem>>, %arg3: memref<12xi32, #tpu.memory_space<smem>>, %arg4: memref<12xi32, #tpu.memory_space<smem>>, %arg5: memref<12xi32, #tpu.memory_space<smem>>) -> (i32, i32, i32) {
    %c6_i32 = arith.constant 6 : i32
    %0 = arith.muli %arg0, %c6_i32 : i32
    %1 = arith.addi %0, %arg1 : i32
    %2 = arith.index_cast %1 : i32 to index
    %3 = memref.load %arg3[%2] : memref<12xi32, #tpu.memory_space<smem>>
    %c0_i32 = arith.constant 0 : i32
    %c0_i32_0 = arith.constant 0 : i32
    %c0_i32_1 = arith.constant 0 : i32
    return %3, %c0_i32, %c0_i32_0 : i32, i32, i32
  }
  func.func @transform_3(%arg0: i32, %arg1: i32, %arg2: memref<12xi32, #tpu.memory_space<smem>>, %arg3: memref<12xi32, #tpu.memory_space<smem>>, %arg4: memref<12xi32, #tpu.memory_space<smem>>, %arg5: memref<12xi32, #tpu.memory_space<smem>>) -> (i32, i32) {
    %c0_i32 = arith.constant 0 : i32
    %c0_i32_0 = arith.constant 0 : i32
    %c0_i32_1 = arith.constant 0 : i32
    return %c0_i32, %c0_i32_0 : i32, i32
  }
  func.func @transform_4(%arg0: i32, %arg1: i32, %arg2: memref<12xi32, #tpu.memory_space<smem>>, %arg3: memref<12xi32, #tpu.memory_space<smem>>, %arg4: memref<12xi32, #tpu.memory_space<smem>>, %arg5: memref<12xi32, #tpu.memory_space<smem>>) -> (i32, i32) {
    %c0_i32 = arith.constant 0 : i32
    %c0_i32_0 = arith.constant 0 : i32
    %c0_i32_1 = arith.constant 0 : i32
    return %c0_i32, %c0_i32_0 : i32, i32
  }
  func.func @transform_5(%arg0: i32, %arg1: i32, %arg2: memref<12xi32, #tpu.memory_space<smem>>, %arg3: memref<12xi32, #tpu.memory_space<smem>>, %arg4: memref<12xi32, #tpu.memory_space<smem>>, %arg5: memref<12xi32, #tpu.memory_space<smem>>) -> (i32, i32, i32) {
    %c0_i32 = arith.constant 0 : i32
    %c0_i32_0 = arith.constant 0 : i32
    %c0_i32_1 = arith.constant 0 : i32
    %c0_i32_2 = arith.constant 0 : i32
    return %c0_i32, %c0_i32_0, %c0_i32_1 : i32, i32, i32
  }
  func.func @transform_6(%arg0: i32, %arg1: i32, %arg2: memref<12xi32, #tpu.memory_space<smem>>, %arg3: memref<12xi32, #tpu.memory_space<smem>>, %arg4: memref<12xi32, #tpu.memory_space<smem>>, %arg5: memref<12xi32, #tpu.memory_space<smem>>) -> (i32, i32, i32) {
    %c0_i32 = arith.constant 0 : i32
    %c0_i32_0 = arith.constant 0 : i32
    %c0_i32_1 = arith.constant 0 : i32
    %c0_i32_2 = arith.constant 0 : i32
    return %c0_i32, %c0_i32_0, %c0_i32_1 : i32, i32, i32
  }
  func.func @transform_7(%arg0: i32, %arg1: i32, %arg2: memref<12xi32, #tpu.memory_space<smem>>, %arg3: memref<12xi32, #tpu.memory_space<smem>>, %arg4: memref<12xi32, #tpu.memory_space<smem>>, %arg5: memref<12xi32, #tpu.memory_space<smem>>) -> (i32, i32, i32) {
    %c0_i32 = arith.constant 0 : i32
    %c0_i32_0 = arith.constant 0 : i32
    %c0_i32_1 = arith.constant 0 : i32
    %c0_i32_2 = arith.constant 0 : i32
    return %c0_i32, %c0_i32_0, %c0_i32_1 : i32, i32, i32
  }
  func.func @transform_8(%arg0: i32, %arg1: i32, %arg2: memref<12xi32, #tpu.memory_space<smem>>, %arg3: memref<12xi32, #tpu.memory_space<smem>>, %arg4: memref<12xi32, #tpu.memory_space<smem>>, %arg5: memref<12xi32, #tpu.memory_space<smem>>) -> (i32, i32, i32) {
    %c0_i32 = arith.constant 0 : i32
    %c0_i32_0 = arith.constant 0 : i32
    %c0_i32_1 = arith.constant 0 : i32
    %c0_i32_2 = arith.constant 0 : i32
    return %c0_i32, %c0_i32_0, %c0_i32_1 : i32, i32, i32
  }
  func.func @transform_9(%arg0: i32, %arg1: i32, %arg2: memref<12xi32, #tpu.memory_space<smem>>, %arg3: memref<12xi32, #tpu.memory_space<smem>>, %arg4: memref<12xi32, #tpu.memory_space<smem>>, %arg5: memref<12xi32, #tpu.memory_space<smem>>) -> (i32, i32) {
    %c0_i32 = arith.constant 0 : i32
    %c0_i32_0 = arith.constant 0 : i32
    return %arg0, %c0_i32 : i32, i32
  }
}

</mosaic_0001>

<bundles_post_ra>
// kernel: tpu_custom_call.1
= control target key start
LH: loop header
LB: loop body
LE: loop exit
PB: predicated region body
PF: predicated region fallthrough
CT: control target
= control target key end

     0   :  { %s3386_s0 = inlined_call_operand.hbm [shape: s32[12], index: 0, kind: input, shape index: {}]   ;;  %s3387_s4 = inlined_call_operand.vmem [shape: f32[3], index: 4, kind: input, shape index: {}]   ;;  %s3388_s5 = inlined_call_operand.hbm [shape: bf16[256,128], index: 5, kind: input, shape index: {}]   ;;  %s3389_s6 = inlined_call_operand.hbm [shape: bf16[12,128,128], index: 6, kind: input, shape index: {}]   ;;  %s3390_s7 = inlined_call_operand.hbm [shape: bf16[128,128], index: 7, kind: input, shape index: {}]   ;;  %s3391_s8 = inlined_call_operand.vmem [shape: f32[1,128], index: 8, kind: input, shape index: {}]   ;;  %s3392_s9 = inlined_call_operand.hbm [shape: bf16[3,128,128], index: 9, kind: input, shape index: {}]   ;;  %s3393_s10 = inlined_call_operand.vmem [shape: f32[3,1,128], index: 10, kind: input, shape index: {}]   ;;  %s3394_s11 = inlined_call_operand.hbm [shape: bf16[3,128,128], index: 11, kind: input, shape index: {}]   ;;  %s3395_s12 = inlined_call_operand.vmem [shape: f32[3,1,128], index: 12, kind: input, shape index: {}]   ;;  %s3396_s13 = inlined_call_operand.hbm [shape: bf16[256,128], index: 13, kind: output, shape index: {}]   ;;  %s3397_s1 = inlined_call_operand.vmem [shape: s32[12], index: 1, kind: input, shape index: {}]   ;;  %s3398_s3 = inlined_call_operand.vmem [shape: s32[12], index: 3, kind: input, shape index: {}]   ;;  %s3399_s2 = inlined_call_operand.hbm [shape: s32[12], index: 2, kind: input, shape index: {}]  }
   0x1   :  { %3416 = sst [smem:[#allocation36_spill]] %s3387_s4  ;;  %s2442_s27 = scalar_lea.hbm %s3386_s0, 16 }
   0x2   :  { %3417 = sst [smem:[#allocation37_spill]] %s3388_s5  ;;  %p2443_p0 = scmp.ne.s32.totalorder %s3386_s0, %s2442_s27 }
   0x3   :  { %3418 = sst [smem:[#allocation38_spill]] %s3390_s7  ;;  %p2446_p1 = scmp.lt.u32.totalorder %s2442_s27, %s3386_s0 }
   0x4   :  { %3419 = sst [smem:[#allocation39_spill]] %s3391_s8 }
   0x5   :  { %3420 = sst [smem:[#allocation40_spill]] %s3392_s9  ;;  %p2448_p2 = pnand %p2446_p1, %p2443_p0 }
   0x6   :  { %3421 = sst [smem:[#allocation41_spill]] %s3393_s10 }
   0x7   :  { %3422 = sst [smem:[#allocation42_spill]] %s3394_s11 }
   0x8   :  { %3423 = sst [smem:[#allocation43_spill]] %s3395_s12 }
   0x9   :  { %3424 = sst [smem:[#allocation44_spill]] %s3396_s13 }
   0xa   :  { %2451 = shalt.err (!%p2448_p2)  }
   0xb   :  { %s2785_s15 = smov [#allocation5]   ;;  %s20_s20 = sshll.u32 %s3397_s1, 4  ;;  %s21_s20 = int_to_ptr.vmem [resolvable:$true] %s20_s20 }
   0xc   :  { %19 = dma.hbm_to_smem %s3386_s0, 16, %s2785_s15, [#allocation4] }
   0xd   :  { %s26_s23 = sshll.u32 %s3398_s3, 4  ;;  %s2452_s24 = scalar_lea.vmem %s21_s20, 16  ;;  %s27_s23 = int_to_ptr.vmem [resolvable:$true] %s26_s23 }
   0xe   :  { %p2453_p3 = scmp.ne.s32.totalorder %s21_s20, %s2452_s24  ;;  %p2457_p4 = scmp.lt.s32.totalorder %s21_s20, %s21_s20 }
   0xf   :  { %p2458_p5 = scmp.lt.s32.totalorder %s2452_s24, %s2452_s24 }
  0x11   :  { %p2459_p6 = por %p2458_p5, %p2457_p4 }
  0x13   :  { %p2460_p7 = pnand %p2459_p6, %p2453_p3 }
  0x15   :  { %2463 = shalt.err (!%p2460_p7)  }
  0x16   :  { %s2786_s25 = smov [#allocation6]   ;;  %s2464_s27 = scalar_lea.hbm %s3399_s2, 16 }
  0x17   :  { %23 = dma.vmem_to_smem %s21_s20, 16, %s2786_s25, [#allocation4] }
  0x18   :  { %p2465_p8 = scmp.ne.s32.totalorder %s3399_s2, %s2464_s27  ;;  %p2468_p9 = scmp.lt.u32.totalorder %s2464_s27, %s3399_s2 }
  0x1a   :  { %p2470_p10 = pnand %p2468_p9, %p2465_p8 }
  0x1c   :  { %2473 = shalt.err (!%p2470_p10)  }
  0x1d   :  { %s2787_s3 = smov [#allocation7]   ;;  %s2474_s16 = scalar_lea.vmem %s27_s23, 16 }
  0x1e   :  { %25 = dma.hbm_to_smem %s3399_s2, 16, %s2787_s3, [#allocation4] }
  0x1f   :  { %p2475_p11 = scmp.ne.s32.totalorder %s27_s23, %s2474_s16  ;;  %p2479_p12 = scmp.lt.s32.totalorder %s27_s23, %s27_s23 }
  0x20   :  { %p2480_p13 = scmp.lt.s32.totalorder %s2474_s16, %s2474_s16 }
  0x22   :  { %p2481_p0 = por %p2480_p13, %p2479_p12 }
  0x24   :  { %p2482_p1 = pnand %p2481_p0, %p2475_p11 }
  0x26   :  { %2485 = shalt.err (!%p2482_p1)  }
  0x27   :  { %s2788_s17 = smov [#allocation8]  }
  0x28   :  { %29 = dma.vmem_to_smem %s27_s23, 16, %s2788_s17, [#allocation4] }
  0x29   :  { %2715 = dma.done.wait [#allocation4], 64 }
  0x2a   :  { %2716 = vsyncadd [#allocation4], 4294967232 }
  0x2b   :  { %31 = sfence }
  0x2c   :  { %32 = vsyncpa [#allocation12], 0 }
  0x2d   :  { %33 = vsyncpa [#allocation10], 0 }
  0x2e   :  { %34 = vsyncpa [#allocation15], 0 }
  0x2f   :  { %36 = vsyncpa [#allocation15 + $0x1], 0 }
  0x30   :  { %37 = vsyncpa [#allocation18], 0 }
  0x31   :  { %38 = vsyncpa [#allocation11], 0 }
  0x32   :  { %40 = vsyncpa [#allocation11 + $0x1], 0  ;;  %s2900_s2 = smov 0   ;;  %s2902_s18 = smov 0  }
  0x33   :  { %s2904_s19 = smov 0   ;;  %s2906_s20 = smov 0  }
  0x34   :  { %s2908_s21 = smov 0   ;;  %s2910_s22 = smov 0  }
  0x35   :  { %s2912_s23 = smov 0   ;;  %s2914_s24 = smov 0  }
  0x36   :  { %s2916_s25 = smov 0   ;;  %s2918_s26 = smov 0  }
  0x37   :  { %s2920_s0 = smov 0  }
  0x38 LB: > { %3425 = sst [smem:[#allocation30_spill]] %s2743_s2  ;;  %s2954_s27 = sadd.s32 4294967295, %s2783_s0   ;;  %s2783_s0 = sphi %s2920_s0, %s46_s0   ;;  %s2779_s26 = sphi %s2918_s26, %s3481_s26   ;;  %s2775_s25 = sphi %s2916_s25, %s3480_s25   ;;  %s2771_s24 = sphi %s2914_s24, %s3479_s24   ;;  %s2767_s23 = sphi %s2912_s23, %s3478_s23   ;;  %s2763_s22 = sphi %s2910_s22, %s3477_s22   ;;  %s2759_s21 = sphi %s2908_s21, %s3476_s21   ;;  %s2755_s20 = sphi %s2906_s20, %s3475_s20   ;;  %s2751_s19 = sphi %s2904_s19, %s3474_s19   ;;  %s2747_s18 = sphi %s2902_s18, %s3473_s18   ;;  %s2743_s2 = sphi %s2900_s2, %s3472_s2  }
  0x39   : > { %3426 = sst [smem:[#allocation31_spill]] %s2767_s23  ;;  %s1795_s28 = sadd.s32 4294967294, %s2783_s0  }
  0x3a   : > { %3427 = sst [smem:[#allocation32_spill]] %s2771_s24  ;;  %p126_p2 = scmp.ne.s32.totalorder %s2759_s21, %s2755_s20 }
  0x3b   : > { %p3405_p3 = scmp.eq.s32.totalorder %s2954_s27, 0  ;;  %p275_p4 = scmp.ne.s32.totalorder %s2751_s19, %s2747_s18 }
  0x3c   : > { %p276_p6 = scmp.eq.s32.totalorder %s2954_s27, 11  ;;  %p281_p7 = scmp.ne.s32.totalorder %s2747_s18, %s2743_s2 }
  0x3d   : > { %p2963_p5 = por %p3405_p3, %p126_p2  ;;  %p282_p8 = scmp.eq.s32.totalorder %s1795_s28, 11 }
  0x3e   : > { %p2970_p9 = por %p276_p6, %p275_p4  ;;  %p1796_p10 = scmp.ge.s32.totalorder %s2783_s0, 1 }
  0x3f   : > { %s3428_s1 = scalar_select %p2963_p5, 1, 0 }
  0x40   : > { %s3429_s29 = scalar_select %p2970_p9, 1, 0 }
  0x41   : > { %p2975_p11 = por %p282_p8, %p281_p7  ;;  %p289_p12 = scmp.lt.s32.totalorder %s2783_s0, 13 }
  0x42   : > { %3430 = sst [smem:[#allocation33_spill]] %s3429_s29  ;;  %s2789_s14 = smov [#allocation16]  }
  0x43   : > { %s3431_s30 = scalar_select %p2975_p11, 1, 0 }
  0x44   : > { %p2980_p13 = pnand %p1796_p10, %p289_p12  ;;  %s325_s15 = sshll.u32 %s2789_s14, 4  ;;  %s326_s15 = int_to_ptr.vmem [resolvable:$true] %s325_s15 }
  0x45   : > { %3432 = sst [smem:[#allocation34_spill]] %s3431_s30  ;;  %s2790_s17 = smov [#allocation17]  }
  0x46   : > { %s3433_s3 = scalar_select %p2980_p13, 1, 0 }
  0x47   : > { %p2255_p0 = pneg %p2980_p13  ;;  %s341_s20 = sshll.u32 %s2790_s17, 4  ;;  %s2992_s20 = int_to_ptr.vmem [resolvable:$true] %s341_s20 }
  0x48   : > { %s3435_s7 = sld [smem:[#allocation38_spill]] }
  0x49   : > { %p2988_p1 = pnand %p2255_p0, %p3405_p3 }
  0x4b   : > { %p3002_p4 = pneg %p2988_p1 }
  0x4e   : > { %s2486_s2 = scalar_lea.hbm %s3435_s7, 1024 }
  0x4f   : > { %p2487_p2 = scmp.ne.s32.totalorder %s3435_s7, %s2486_s2  ;;  %p2493_p8 = scmp.lt.u32.totalorder %s2486_s2, %s3435_s7 }
  0x51   : > { %p2489_p6 = pnand %p3002_p4, %p2487_p2 }
  0x53   : > { %p2490_p7 = pneg %p2489_p6 }
  0x55   : > { %p2495_p10 = pnand %p2493_p8, %p2490_p7 }
  0x57   : > { %2498 = shalt.err (!%p2495_p10)
}
  0x58   : > { %s2499_s30 = scalar_lea.vmem %s326_s15, 1024  ;;  %p2507_p11 = scmp.lt.s32.totalorder %s326_s15, %s326_s15 }
  0x59   : > { %p2500_p12 = scmp.ne.s32.totalorder %s326_s15, %s2499_s30  ;;  %p2508_p9 = scmp.lt.s32.totalorder %s2499_s30, %s2499_s30 }
  0x5b   : > { %p2502_p0 = pnand %p2500_p12, %p3002_p4  ;;  %p2509_p5 = por %p2508_p9, %p2507_p11 }
  0x5d   : > { %p2503_p3 = pneg %p2502_p0 }
  0x5f   : > { %p2510_p13 = pnand %p2509_p5, %p2503_p3 }
  0x61   : > { %2513 = shalt.err (!%p2510_p13)
}
  0x62   : > { %s3411_s13 = smov 64   ;;  %s3413_s29 = smov 4  }
  0x63   : > { %2264 = dma.hbm_to_vmem [thread:$0]  (!%p2988_p1), %s3435_s7, 1024, %s326_s15, [#allocation15], %s3411_s13, %s3411_s13, %s3413_s29  }
  0x64   : > { %s3437_s9 = sld [smem:[#allocation40_spill]] }
  0x6a   : > { %s2514_s10 = scalar_lea.hbm %s3437_s9, 3072 }
  0x6b   : > { %p2515_p3 = scmp.ne.s32.totalorder %s3437_s9, %s2514_s10  ;;  %p2521_p11 = scmp.lt.u32.totalorder %s2514_s10, %s3437_s9 }
  0x6d   : > { %p2517_p5 = pnand %p2515_p3, %p3002_p4 }
  0x6f   : > { %p2518_p9 = pneg %p2517_p5 }
  0x71   : > { %p2523_p13 = pnand %p2521_p11, %p2518_p9 }
  0x73   : > { %2526 = shalt.err (!%p2523_p13)
}
  0x74   : > { %s2527_s15 = scalar_lea.vmem %s2992_s20, 3072  ;;  %p2535_p8 = scmp.lt.s32.totalorder %s2992_s20, %s2992_s20 }
  0x75   : > { %p2528_p2 = scmp.ne.s32.totalorder %s2992_s20, %s2527_s15  ;;  %p2536_p10 = scmp.lt.s32.totalorder %s2527_s15, %s2527_s15 }
  0x77   : > { %p2530_p6 = pnand %p2528_p2, %p3002_p4  ;;  %p2537_p12 = por %p2536_p10, %p2535_p8 }
  0x79   : > { %p2531_p7 = pneg %p2530_p6 }
  0x7b   : > { %p2538_p0 = pnand %p2537_p12, %p2531_p7 }
  0x7d   : > { %2541 = shalt.err (!%p2538_p0)
}
  0x7e   : > { %2267 = dma.hbm_to_vmem [thread:$0]  (!%p2988_p1), %s3437_s9, 3072, %s2992_s20, [#allocation18], %s3411_s13, %s3411_s13, %s3413_s29  }
  0x7f   : > { %s3438_s4 = sld [smem:[#allocation36_spill]] }
  0x85   : > { %s302_s12 = sshll.u32 %s3438_s4, 4  ;;  %s303_s12 = int_to_ptr.vmem [resolvable:$true] %s302_s12 }
  0x86   : > { %s2542_s2 = scalar_lea.vmem %s303_s12, 16  ;;  %p2550_p11 = scmp.lt.s32.totalorder %s303_s12, %s303_s12 }
  0x87   : > { %p2543_p3 = scmp.ne.s32.totalorder %s303_s12, %s2542_s2  ;;  %p2551_p13 = scmp.lt.s32.totalorder %s2542_s2, %s2542_s2 }
  0x89   : > { %p2545_p5 = pnand %p2543_p3, %p3002_p4  ;;  %p2552_p2 = por %p2551_p13, %p2550_p11 }
  0x8b   : > { %p2546_p9 = pneg %p2545_p5 }
  0x8d   : > { %p2553_p6 = pnand %p2552_p2, %p2546_p9 }
  0x8f   : > { %2556 = shalt.err (!%p2553_p6)
}
  0x90   : > { %s2793_s28 = smov [#allocation9]   ;;  %s2794_s20 = smov [#allocation13]  }
  0x91   : > { %2258 = dma.vmem_to_smem (!%p2988_p1), %s303_s12, 16, %s2793_s28, [#allocation12]  }
  0x92   : > { %s312_s17 = sshll.u32 %s2794_s20, 4  ;;  %s2795_s30 = smov [#allocation19]   ;;  %s313_s17 = int_to_ptr.vmem [resolvable:$true] %s312_s17 }
  0x93   : > { %s357_s15 = sshll.u32 %s2795_s30, 4  ;;  %s3439_s5 = sld [smem:[#allocation37_spill]]  ;;  %s358_s15 = int_to_ptr.vmem [resolvable:$true] %s357_s15 }
  0x99   : > { %s2557_s23 = scalar_lea.hbm %s3439_s5, 2048 }
  0x9a   : > { %p2558_p7 = scmp.ne.s32.totalorder %s3439_s5, %s2557_s23  ;;  %p2564_p12 = scmp.lt.u32.totalorder %s2557_s23, %s3439_s5 }
  0x9c   : > { %p2560_p8 = pnand %p2558_p7, %p3002_p4 }
  0x9e   : > { %p2561_p10 = pneg %p2560_p8 }
  0xa0   : > { %p2566_p0 = pnand %p2564_p12, %p2561_p10 }
  0xa2   : > { %2569 = shalt.err (!%p2566_p0)
}
  0xa3   : > { %s2570_s12 = scalar_lea.vmem %s313_s17, 2048  ;;  %p2578_p11 = scmp.lt.s32.totalorder %s313_s17, %s313_s17 }
  0xa4   : > { %p2571_p3 = scmp.ne.s32.totalorder %s313_s17, %s2570_s12  ;;  %p2579_p13 = scmp.lt.s32.totalorder %s2570_s12, %s2570_s12 }
  0xa6   : > { %p2573_p5 = pnand %p2571_p3, %p3002_p4  ;;  %p2580_p2 = por %p2579_p13, %p2578_p11 }
  0xa8   : > { %p2574_p9 = pneg %p2573_p5 }
  0xaa   : > { %p2581_p6 = pnand %p2580_p2, %p2574_p9 }
  0xac   : > { %2584 = shalt.err (!%p2581_p6)
}
  0xad   : > { %s3440_s13 = smov 4   ;;  %s3441_s28 = smov 64  }
  0xae   : > { %2261 = dma.hbm_to_vmem [thread:$0]  (!%p2988_p1), %s3439_s5, 2048, %s313_s17, [#allocation10], %s3441_s28, %s3441_s28, %s3440_s13  }
  0xaf   : > { %s3442_s11 = sld [smem:[#allocation42_spill]] }
  0xb5   : > { %s2585_s10 = scalar_lea.hbm %s3442_s11, 3072 }
  0xb6   : > { %p2586_p7 = scmp.ne.s32.totalorder %s3442_s11, %s2585_s10  ;;  %p2592_p12 = scmp.lt.u32.totalorder %s2585_s10, %s3442_s11 }
  0xb8   : > { %p2588_p8 = pnand %p2586_p7, %p3002_p4 }
  0xba   : > { %p2589_p10 = pneg %p2588_p8 }
  0xbc   : > { %p2594_p0 = pnand %p2592_p12, %p2589_p10 }
  0xbe   : > { %2597 = shalt.err (!%p2594_p0)
}
  0xbf   : > { %s2598_s29 = scalar_lea.vmem %s358_s15, 3072  ;;  %p2606_p11 = scmp.lt.s32.totalorder %s358_s15, %s358_s15 }
  0xc0   : > { %p2599_p3 = scmp.ne.s32.totalorder %s358_s15, %s2598_s29  ;;  %p2607_p13 = scmp.lt.s32.totalorder %s2598_s29, %s2598_s29 }
  0xc2   : > { %p2601_p5 = pnand %p2599_p3, %p3002_p4  ;;  %p2608_p2 = por %p2607_p13, %p2606_p11 }
  0xc4   : > { %p2602_p9 = pneg %p2601_p5 }
  0xc6   : > { %p2609_p6 = pnand %p2608_p2, %p2602_p9 }
  0xc8   : > { %2612 = shalt.err (!%p2609_p6)
}
  0xc9   : > { %2270 = dma.hbm_to_vmem [thread:$0]  (!%p2988_p1), %s3442_s11, 3072, %s358_s15, [#allocation18], %s3441_s28, %s3441_s28, %s3440_s13  }
  0xca   : > { %s55_s14 = sadd.s32 1, %s2775_s25  ;;  %s58_s16 = sadd.s32 1, %s2779_s26 }
  0xcb   : > { %p56_p4 = scmp.ge.s32.totalorder %s55_s14, 6  ;;  %s104_s30 = smul.u32 6, %s2779_s26 }
  0xcc   : > { %p120_p8 = scmp.ne.s32.totalorder %s2763_s22, %s2759_s21  ;;  %p121_p10 = scmp.eq.s32.totalorder %s2783_s0, 0 }
  0xcd   : > { %s3483_s16 = smov (!%p56_p4, %s58_s16), %s2779_s26  ;;  %s3485_s14 = smov (%p56_p4, %s55_s14), 0 }
  0xce   : > { %p60_p7 = scmp.ge.s32.totalorder %s3483_s16, 2  ;;  %s105_s8 = sadd.s32 %s2775_s25, %s104_s30 }
  0xcf   : > { %s265_s15 = sadd.s32 1, %s2751_s19  ;;  %s106_s10 = sld [smem:[#allocation6 + %s105_s8]] }
  0xd0   : > { %s3487_s16 = smov (%p60_p7, %s3483_s16), 0  ;;  %p3112_p1 = por %p121_p10, %p120_p8 }
  0xd1   : > { %3443 = sst [smem:[#allocation35_spill]] %s3487_s16  ;;  %s107_s23 = smul.u32 6, %s3487_s16 }
  0xd2   : > { %s262_s24 = ssub.s32 %s2779_s26, %s3487_s16  ;;  %s376_s29 = sand.u32 1, %s2763_s22  }
  0xd3   : > { %p263_p12 = scmp.eq.s32.totalorder %s262_s24, 0  ;;  %s108_s12 = sadd.s32 %s107_s23, %s3485_s14 }
  0xd4   : > { %s109_s17 = sld [smem:[#allocation6 + %s108_s12]]  ;;  %p2286_p0 = scmp.lt.s32.totalorder %s2783_s0, 12 }
  0xd5   : > { %s3120_s20 = scalar_select %p263_p12, %s2751_s19, %s265_s15  }
  0xd6   : > { %s113_s30 = sadd.s32 1, %s2763_s22  ;;  %s1803_s4 = sshll.u32 %s376_s29, 6 }
  0xd7   : > { %s2239_s5 = scalar_select %p3112_p1, [#allocation6], [#allocation21] }
  0xd8   : > { %s3489_s8 = smov (!%p3112_p1, %s105_s8), 0  ;;  %p3129_p3 = pnand %p2286_p0, %p3112_p1 }
  0xd9   : > { %s3491_s5 = smov (!%p2286_p0, %s2239_s5), [#allocation22]  ;;  %s3493_s8 = smov (!%p2286_p0, %s3489_s8), 0 }
  0xda   : > { %s110_s7 = ssub.s32 %s106_s10, %s109_s17  ;;  %s381_s15 = sld [smem:[%s3491_s5 + %s3493_s8]] }
  0xdb   : > { %p111_p5 = scmp.eq.s32.totalorder %s110_s7, 0  ;;  %s374_s24 = sand.u32 1, %s2783_s0  }
  0xdc   : > { %s378_s12 = scalar_lea.vmem [#allocation14], %s1803_s4  ;;  %s3144_s7 = scalar_lea.sflag [#allocation15], %s374_s24 }
  0xdd   : > { %s3134_s23 = scalar_select %p111_p5, %s2763_s22, %s113_s30  }
  0xde   : > { %s388_s29 = sshll.u32 %s378_s12, 4  ;;  %p2615_p11 = pneg %p3129_p3  ;;  %s3137_s29 = int_to_ptr.vmem [resolvable:$true] %s388_s29 }
  0xdf   : > { %s2618_s16 = scalar_lea.hbm %s3389_s6, 12288 }
  0xe0   : > { %s1899_s11 = sshll.u32 %s381_s15, 10 }
  0xe1   : > { %s3142_s2 = scalar_lea.hbm %s3389_s6, %s1899_s11 }
  0xe2   : > { %s2613_s17 = scalar_lea.hbm %s3142_s2, 1024  ;;  %p2619_p6 = scmp.lt.u32.totalorder %s3142_s2, %s3389_s6 }
  0xe3   : > { %p2614_p9 = scmp.ne.s32.totalorder %s3142_s2, %s2613_s17  ;;  %p2620_p4 = scmp.lt.u32.totalorder %s2618_s16, %s2613_s17 }
  0xe4   : > { %p2622_p8 = scmp.lt.u32.totalorder %s2613_s17, %s3142_s2 }
  0xe5   : > { %p2616_p13 = pnand %p2615_p11, %p2614_p9  ;;  %p2621_p7 = por %p2620_p4, %p2619_p6 }
  0xe7   : > { %p2617_p2 = pneg %p2616_p13  ;;  %p2623_p10 = por %p2622_p8, %p2621_p7 }
  0xe9   : > { %p2624_p1 = pnand %p2623_p10, %p2617_p2 }
  0xeb   : > { %2627 = shalt.err (!%p2624_p1)
}
  0xec   : > { %s2628_s30 = scalar_lea.vmem %s3137_s29, 1024  ;;  %s2796_s15 = smov [#allocation14]  }
  0xed   : > { %p2629_p12 = scmp.ne.s32.totalorder %s3137_s29, %s2628_s30  ;;  %s2633_s24 = sshll.u32 %s2796_s15, 4  ;;  %s2634_s24 = int_to_ptr.vmem [resolvable:$false] %s2633_s24 }
  0xee   : > { %s2635_s12 = scalar_lea.vmem %s2634_s24, 2048  ;;  %p2636_p9 = scmp.lt.s32.totalorder %s3137_s29, %s2634_s24 }
  0xef   : > { %p2631_p0 = pnand %p2629_p12, %p2615_p11  ;;  %p2637_p13 = scmp.lt.s32.totalorder %s2635_s12, %s2628_s30 }
  0xf1   : > { %p2632_p5 = pneg %p2631_p0  ;;  %p2638_p6 = por %p2637_p13, %p2636_p9 }
  0xf3   : > { %p2639_p4 = pnand %p2638_p6, %p2632_p5 }
  0xf5   : > { %2642 = shalt.err (!%p2639_p4)
}
  0xf6   : > { %2276 = dma.hbm_to_vmem [thread:$0]  (!%p3129_p3), %s3142_s2, 1024, %s3137_s29, %s3144_s7, %s3441_s28, %s3441_s28, %s3440_s13  }
  0xf7   : > { %p3446_p11 = scmp.ne.s32.totalorder %s3433_s3, 0 }
  0xf8   : > { %p3447_p2 = scmp.eq.s32.totalorder (!%p3446_p11), %s2954_s27, 0 }
  0xf9   : > { %400 = sbr.rel (%p3446_p11) target bundleno = 1380 (0x564), region = 56 }
 0x100   : > { %2718 = dma.done.wait (%p3447_p2), [#allocation12], 16   ;;  %p3448_p7 = pmov %p3447_p2 }
 0x101   : > { %p3449_p8 = pmov %p3447_p2 }
 0x102   : > { %2720 = vsyncadd (%p3448_p7), [#allocation12], 4294967280 }
 0x103   : > { %2722 = dma.done.wait (%p3449_p8), [#allocation10], 2048   ;;  %p3450_p10 = pmov %p3447_p2 }
 0x104   : > { %s410_s9 = sand.u32 1, %s2954_s27   ;;  %s412_s13 = sand.u32 1, %s2759_s21  }
 0x105   : > { %2724 = vsyncadd (%p3450_p10), [#allocation10], 4294965248  ;;  %s1809_s28 = sshll.u32 %s412_s13, 6  ;;  %s411_s3 = scalar_lea.sflag [#allocation15], %s410_s9 }
 0x106   : > { %s3187_s29 = scalar_lea.vmem [#allocation14], %s1809_s28  ;;  %p3451_p3 = scmp.ne.s32.totalorder %s3428_s1, 0 }
 0x108   : > { %2726 = dma.done.wait (%p3451_p3), %s411_s3, 1024  }
 0x109   : > { %2728 = vsyncadd (%p3451_p3), %s411_s3, 4294966272  ;;  %p3452_p1 = pmov %p3447_p2 }
 0x10b   : > { %2730 = dma.done.wait (%p3452_p1), [#allocation15], 1024   ;;  %p3453_p12 = pmov %p3452_p1 }
 0x10c   : > { %p3454_p0 = pmov %p3452_p1 }
 0x10d   : > { %2732 = vsyncadd (%p3453_p12), [#allocation15], 4294966272 }
 0x10e   : > { %2734 = dma.done.wait (%p3454_p0), [#allocation18], 6144   ;;  %p3455_p5 = pmov %p3454_p0 }
 0x110   : > { %2736 = vsyncadd (%p3455_p5), [#allocation18], 4294961152 }
 0x111   : > { %431 = sfence }
 0x112   : > { %s3456_s10 = sld [smem:[#allocation32_spill]]  ;;  %s3457_s2 = sld [smem:[#allocation31_spill]] }
 0x113   : > { %s459_s1 = sand.u32 1, %s2747_s18  }
 0x114   : > { %s1813_s17 = sshll.u32 %s459_s1, 6 }
 0x115   : > { %s3215_s27 = scalar_lea.vmem [#allocation20], %s1813_s17 }
 0x118   : > { %s467_s7 = smul.u32 6, %s3456_s10  ;;  %s1814_s4 = sshll.u32 %s3456_s10, 7 }
 0x119   : > { %p1815_p9 = scmp.ne.s32.totalorder %s3457_s2, 0 }
 0x11a   : > { %s3207_s5 = sadd.s32 %s3457_s2, %s467_s7  ;;  %v2394_v0 = vld [vmem:[#allocation16] sm:$0xff] (!%p1815_p9)   ;;  %s476_s30 = sshra.s32 (!%p1815_p9), %s1814_s4, 3  ;;  %v2395_v1 = vld [vmem:[#allocation16 + $0x8] sm:$0xff] (!%p1815_p9)   ;;  %v2396_v2 = vld [vmem:[#allocation16 + $0x10] sm:$0xff] (!%p1815_p9)  }
 0x11b   : > { %s3210_s16 = sld [smem:[#allocation5 + %s3207_s5]]  ;;  %475 = sbr.rel (%p1815_p9) target bundleno = 541 (0x21d), region = 84  ;;  %2069 = vmatprep.subr.bf16.mxu0 (!%p1815_p9), %v2394_v0  ;;  %2197 = vmatprep.subr.bf16.mxu1 (!%p1815_p9), %v2394_v0  ;;  %v2397_v3 = vld [vmem:[#allocation16 + $0x18] sm:$0xff] (!%p1815_p9)   ;;  %v2398_v6 = vld [vmem:[#allocation16 + $0x20] sm:$0xff] (!%p1815_p9)   ;;  %v2399_v7 = vld [vmem:[#allocation16 + $0x28] sm:$0xff] (!%p1815_p9)  }
 0x11c   : > { %s3213_s11 = sld [smem:[#allocation8 + %s3207_s5]]  ;;  %s1816_s15 = sshll.u32 (!%p1815_p9), %s476_s30, 2  ;;  %2070 = vmatpush3.bf16.msra.mxu0 (!%p1815_p9), %v2394_v0  ;;  %2205 = vmatpush3.bf16.msra.mxu1 (!%p1815_p9), %v2394_v0  ;;  %v2400_v8 = vld [vmem:[#allocation16 + $0x30] sm:$0xff] (!%p1815_p9)   ;;  %v2401_v9 = vld [vmem:[#allocation16 + $0x38] sm:$0xff] (!%p1815_p9)  }
 0x11d   : > { %2071 = vmatprep.subr.bf16.mxu0 (!%p1815_p9), %v2395_v1  ;;  %2198 = vmatprep.subr.bf16.mxu1 (!%p1815_p9), %v2395_v1  ;;  %s3220_s24 = scalar_lea.vmem (!%p1815_p9), [#allocation13], %s1816_s15  ;;  %s3459_s13 = sld [smem:[#allocation39_spill]] (!%p1815_p9) }
 0x11e   : > { %v2402_v4 = vld [vmem:[%s3220_s24] sm:$0xff] (!%p1815_p9)   ;;  %v2404_v10 = vld [vmem:[%s3220_s24 + $0x8] sm:$0xff] (!%p1815_p9)   ;;  %v2406_v12 = vld [vmem:[%s3220_s24 + $0x10] sm:$0xff] (!%p1815_p9)  }
 0x11f   : > { %v2403_v5 = vld [vmem:[%s3220_s24 + $0x20] sm:$0xff] (!%p1815_p9)   ;;  %2085 = vmatprep.mubr.bf16.mxu0 (!%p1815_p9), %v2402_v4  ;;  %v2405_v11 = vld [vmem:[%s3220_s24 + $0x28] sm:$0xff] (!%p1815_p9)   ;;  %v2407_v13 = vld [vmem:[%s3220_s24 + $0x30] sm:$0xff] (!%p1815_p9)  }
 0x120   : > { %2072 = vmatpush3.bf16.msra.mxu0 (!%p1815_p9), %v2395_v1  ;;  %2206 = vmatpush3.bf16.msra.mxu1 (!%p1815_p9), %v2395_v1  ;;  %v2408_v14 = vld [vmem:[%s3220_s24 + $0x18] sm:$0xff] (!%p1815_p9)  }
 0x121   : > { %2073 = vmatprep.subr.bf16.mxu0 (!%p1815_p9), %v2396_v2  ;;  %2199 = vmatprep.subr.bf16.mxu1 (!%p1815_p9), %v2396_v2  ;;  %v2409_v15 = vld [vmem:[%s3220_s24 + $0x38] sm:$0xff] (!%p1815_p9)  }
 0x122   : > { %2093 = vmatprep.mubr.bf16.mxu1 %v2403_v5 }
 0x123   : > { %v1817_v16 = vld [vmem:[%s3459_s13] ss:$0 sm:$0xff] }
 0x124   : > { %2074 = vmatpush3.bf16.msra.mxu0 %v2396_v2  ;;  %2207 = vmatpush3.bf16.msra.mxu1 %v2396_v2 }
 0x125   : > { %2075 = vmatprep.subr.bf16.mxu0 %v2397_v3  ;;  %2200 = vmatprep.subr.bf16.mxu1 %v2397_v3 }
 0x128   : > { %2076 = vmatpush3.bf16.msra.mxu0 %v2397_v3  ;;  %2208 = vmatpush3.bf16.msra.mxu1 %v2397_v3 }
 0x129   : > { %2077 = vmatprep.subr.bf16.mxu0 %v2398_v6  ;;  %2201 = vmatprep.subr.bf16.mxu1 %v2398_v6 }
 0x12c   : > { %2078 = vmatpush3.bf16.msra.mxu0 %v2398_v6  ;;  %2209 = vmatpush3.bf16.msra.mxu1 %v2398_v6 }
 0x12d   : > { %2079 = vmatprep.subr.bf16.mxu0 %v2399_v7  ;;  %2202 = vmatprep.subr.bf16.mxu1 %v2399_v7 }
 0x130   : > { %2080 = vmatpush3.bf16.msra.mxu0 %v2399_v7  ;;  %2210 = vmatpush3.bf16.msra.mxu1 %v2399_v7 }
 0x131   : > { %2081 = vmatprep.subr.bf16.mxu0 %v2400_v8  ;;  %2203 = vmatprep.subr.bf16.mxu1 %v2400_v8 }
 0x134   : > { %2082 = vmatpush3.bf16.msra.mxu0 %v2400_v8  ;;  %2211 = vmatpush3.bf16.msra.mxu1 %v2400_v8 }
 0x135   : > { %2083 = vmatprep.subr.bf16.mxu0 %v2401_v9  ;;  %2204 = vmatprep.subr.bf16.mxu1 %v2401_v9 }
 0x138   : > { %2084 = vmatpush3.bf16.msra.mxu0 %v2401_v9  ;;  %2212 = vmatpush3.bf16.msra.mxu1 %v2401_v9 }
 0x13b   : > { %2086 = vmatmul.mubr.bf16.vlgmr.msra.gmra.mrb[0].mxu0 %v2404_v10  ;;  %2094 = vmatmul.mubr.bf16.vlgmr.msra.gmra.mrb[0].mxu1 %v2405_v11 }
 0x13c   : > { %2089 = vmatprep.mubr.bf16.mxu0 %v2406_v12  ;;  %2097 = vmatprep.mubr.bf16.mxu1 %v2407_v13 }
 0x143   : > { %2090 = vmatmul.mubr.bf16.gmra.mrb[4].mxu0 %v2408_v14  ;;  %2098 = vmatmul.mubr.bf16.gmra.mrb[4].mxu1 %v2409_v15 }
 0x20e   : > { %v2087_v17 = vpop.f32.mrb[0].mxu0  ;;  %v2095_v18 = vpop.f32.mrb[0].mxu1 }
 0x20f   : > { %v658_v19 = vadd.f32 %v2087_v17, %v1817_v16  ;;  %v690_v20 = vadd.f32 %v2095_v18, %v1817_v16  ;;  %v649_v21 = vpop.f32.mrb[1].mxu0  ;;  %v681_v22 = vpop.f32.mrb[1].mxu1 }
 0x210   : > { %v650_v23 = vadd.f32 %v1817_v16, %v649_v21  ;;  %v682_v24 = vadd.f32 %v1817_v16, %v681_v22  ;;  %v2088_v25 = vpop.f32.mrb[2].mxu0  ;;  %v2096_v26 = vpop.f32.mrb[2].mxu1 }
 0x211   : > { %714 = vst [vmem:[#allocation3 + $0x10] sm:$0xff] %v658_v19  ;;  %722 = vst [vmem:[#allocation3 + $0x50] sm:$0xff] %v690_v20  ;;  %v661_v27 = vadd.f32 %v2088_v25, %v1817_v16  ;;  %v693_v28 = vadd.f32 %v2096_v26, %v1817_v16  ;;  %v652_v29 = vpop.f32.mrb[3].mxu0  ;;  %v684_v30 = vpop.f32.mrb[3].mxu1 }
 0x212   : > { %712 = vst [vmem:[#allocation3] sm:$0xff] %v650_v23  ;;  %720 = vst [vmem:[#allocation3 + $0x40] sm:$0xff] %v682_v24  ;;  %v653_v31 = vadd.f32 %v1817_v16, %v652_v29  ;;  %v685_v32 = vadd.f32 %v1817_v16, %v684_v30 }
 0x213   : > { %715 = vst [vmem:[#allocation3 + $0x18] sm:$0xff] %v661_v27  ;;  %723 = vst [vmem:[#allocation3 + $0x58] sm:$0xff] %v693_v28 }
 0x214   : > { %713 = vst [vmem:[#allocation3 + $0x8] sm:$0xff] %v653_v31  ;;  %721 = vst [vmem:[#allocation3 + $0x48] sm:$0xff] %v685_v32 }
 0x216   : > { %v2091_v33 = vpop.f32.mrb[4].mxu0  ;;  %v2099_v34 = vpop.f32.mrb[4].mxu1 }
 0x217   : > { %v674_v35 = vadd.f32 %v2091_v33, %v1817_v16  ;;  %v706_v36 = vadd.f32 %v2099_v34, %v1817_v16  ;;  %v665_v37 = vpop.f32.mrb[5].mxu0  ;;  %v697_v38 = vpop.f32.mrb[5].mxu1 }
 0x218   : > { %v666_v39 = vadd.f32 %v1817_v16, %v665_v37  ;;  %v698_v40 = vadd.f32 %v1817_v16, %v697_v38  ;;  %v2092_v41 = vpop.f32.mrb[6].mxu0  ;;  %v2100_v42 = vpop.f32.mrb[6].mxu1 }
 0x219   : > { %718 = vst [vmem:[#allocation3 + $0x30] sm:$0xff] %v674_v35  ;;  %726 = vst [vmem:[#allocation3 + $0x70] sm:$0xff] %v706_v36  ;;  %v677_v43 = vadd.f32 %v2092_v41, %v1817_v16  ;;  %v709_v44 = vadd.f32 %v2100_v42, %v1817_v16  ;;  %v668_v45 = vpop.f32.mrb[7].mxu0  ;;  %v700_v46 = vpop.f32.mrb[7].mxu1 }
 0x21a   : > { %716 = vst [vmem:[#allocation3 + $0x20] sm:$0xff] %v666_v39  ;;  %724 = vst [vmem:[#allocation3 + $0x60] sm:$0xff] %v698_v40  ;;  %v669_v47 = vadd.f32 %v1817_v16, %v668_v45  ;;  %v701_v48 = vadd.f32 %v1817_v16, %v700_v46 }
 0x21b   : > { %719 = vst [vmem:[#allocation3 + $0x38] sm:$0xff] %v677_v43  ;;  %727 = vst [vmem:[#allocation3 + $0x78] sm:$0xff] %v709_v44 }
 0x21c   : > { %717 = vst [vmem:[#allocation3 + $0x28] sm:$0xff] %v669_v47  ;;  %725 = vst [vmem:[#allocation3 + $0x68] sm:$0xff] %v701_v48 }
 0x21d PF: > { %s728_s28 = sand.u32 1, %s3213_s11 }
 0x21e   : > { %p1834_p13 = scmp.eq.s32.totalorder %s728_s28, 0 }
 0x21f   : > { %s733_s10 = sshra.s32 (!%p1834_p13), %s1814_s4, 3  ;;  %s753_s2 = sld [smem:[#allocation9 + %s3210_s16]] (!%p1834_p13) }
 0x220   : > { %732 = sbr.rel (%p1834_p13) target bundleno = 562 (0x232), region = 88  ;;  %s1835_s7 = sshll.u32 (!%p1834_p13), %s733_s10, 2 }
 0x221   : > { %s736_s17 = scalar_lea.vmem (!%p1834_p13), [#allocation13], %s1835_s7 }
 0x222   : > { %v1920_v49 = vld [vmem:[%s736_s17] sm:$0xff] (!%p1834_p13)   ;;  %v1991_v50 = vld [vmem:[%s736_s17 + $0x8] sm:$0xff] (!%p1834_p13)   ;;  %v1992_v51 = vld [vmem:[%s736_s17 + $0x10] sm:$0xff] (!%p1834_p13)  }
 0x223   : > { %v1921_v52 = vunpack.c.l.bf16 (!%p1834_p13), %v1920_v49  ;;  %v1993_v53 = vld [vmem:[%s736_s17 + $0x18] sm:$0xff] (!%p1834_p13)   ;;  %v1994_v54 = vld [vmem:[%s736_s17 + $0x20] sm:$0xff] (!%p1834_p13)   ;;  %v1995_v55 = vld [vmem:[%s736_s17 + $0x28] sm:$0xff] (!%p1834_p13)   ;;  %v1922_v56 = vunpack.c.h.bf16 (!%p1834_p13), %v1920_v49  ;;  %v1925_v57 = vunpack.c.l.bf16 (!%p1834_p13), %v1991_v50  ;;  %v1926_v58 = vunpack.c.h.bf16 (!%p1834_p13), %v1991_v50 }
 0x224   : > { %v1929_v59 = vunpack.c.l.bf16 (!%p1834_p13), %v1992_v51  ;;  %v1996_v60 = vld [vmem:[%s736_s17 + $0x30] sm:$0xff] (!%p1834_p13)   ;;  %v1997_v61 = vld [vmem:[%s736_s17 + $0x38] sm:$0xff] (!%p1834_p13)   ;;  %v1930_v62 = vunpack.c.h.bf16 (!%p1834_p13), %v1992_v51  ;;  %v1933_v63 = vunpack.c.l.bf16 (!%p1834_p13), %v1993_v53  ;;  %v1934_v0 = vunpack.c.h.bf16 (!%p1834_p13), %v1993_v53 }
 0x225   : > { %s754_s8 = sadd.f32 (!%p1834_p13), 1.0, %s753_s2  ;;  %v1937_v1 = vunpack.c.l.bf16 (!%p1834_p13), %v1994_v54  ;;  %v1938_v2 = vunpack.c.h.bf16 (!%p1834_p13), %v1994_v54  ;;  %v1941_v3 = vunpack.c.l.bf16 (!%p1834_p13), %v1995_v55  ;;  %v1942_v4 = vunpack.c.h.bf16 (!%p1834_p13), %v1995_v55 }
 0x226   : > { %v1945_v5 = vunpack.c.l.bf16 (!%p1834_p13), %v1996_v60  ;;  %v1946_v7 = vunpack.c.h.bf16 (!%p1834_p13), %v1996_v60  ;;  %v1949_v8 = vunpack.c.l.bf16 (!%p1834_p13), %v1997_v61  ;;  %v1950_v9 = vunpack.c.h.bf16 (!%p1834_p13), %v1997_v61 }
 0x227   : > { %v771_v6 = vstv %s754_s8 }
 0x228   : > { %v772_v10 = vmul.f32 %v1921_v52, %v771_v6  ;;  %v773_v11 = vmul.f32 %v1922_v56, %v771_v6  ;;  %v774_v12 = vmul.f32 %v1925_v57, %v771_v6  ;;  %v775_v13 = vmul.f32 %v1926_v58, %v771_v6 }
 0x229   : > { %v776_v14 = vmul.f32 %v1929_v59, %v771_v6  ;;  %v777_v15 = vmul.f32 %v1930_v62, %v771_v6  ;;  %v778_v16 = vmul.f32 %v1933_v63, %v771_v6  ;;  %v779_v17 = vmul.f32 %v1934_v0, %v771_v6 }
 0x22a   : > { %788 = vst [vmem:[#allocation2] sm:$0xff] %v772_v10  ;;  %789 = vst [vmem:[#allocation2 + $0x8] sm:$0xff] %v773_v11  ;;  %v780_v18 = vmul.f32 %v1937_v1, %v771_v6  ;;  %v781_v19 = vmul.f32 %v1938_v2, %v771_v6  ;;  %v782_v20 = vmul.f32 %v1941_v3, %v771_v6 }
 0x22b   : > { %790 = vst [vmem:[#allocation2 + $0x10] sm:$0xff] %v774_v12  ;;  %791 = vst [vmem:[#allocation2 + $0x18] sm:$0xff] %v775_v13  ;;  %v783_v21 = vmul.f32 %v1942_v4, %v771_v6  ;;  %v784_v22 = vmul.f32 %v1945_v5, %v771_v6  ;;  %v785_v23 = vmul.f32 %v1946_v7, %v771_v6 }
 0x22c   : > { %792 = vst [vmem:[#allocation2 + $0x20] sm:$0xff] %v776_v14  ;;  %793 = vst [vmem:[#allocation2 + $0x28] sm:$0xff] %v777_v15  ;;  %v786_v24 = vmul.f32 %v1949_v8, %v771_v6  ;;  %v787_v25 = vmul.f32 %v1950_v9, %v771_v6 }
 0x22d   : > { %794 = vst [vmem:[#allocation2 + $0x30] sm:$0xff] %v778_v16  ;;  %795 = vst [vmem:[#allocation2 + $0x38] sm:$0xff] %v779_v17 }
 0x22e   : > { %796 = vst [vmem:[#allocation2 + $0x40] sm:$0xff] %v780_v18  ;;  %797 = vst [vmem:[#allocation2 + $0x48] sm:$0xff] %v781_v19 }
 0x22f   : > { %798 = vst [vmem:[#allocation2 + $0x50] sm:$0xff] %v782_v20  ;;  %799 = vst [vmem:[#allocation2 + $0x58] sm:$0xff] %v783_v21 }
 0x230   : > { %800 = vst [vmem:[#allocation2 + $0x60] sm:$0xff] %v784_v22  ;;  %801 = vst [vmem:[#allocation2 + $0x68] sm:$0xff] %v785_v23 }
 0x231   : > { %802 = vst [vmem:[#allocation2 + $0x70] sm:$0xff] %v786_v24  ;;  %803 = vst [vmem:[#allocation2 + $0x78] sm:$0xff] %v787_v25 }
 0x232 PF: > { %s804_s4 = sand.u32 2, %s3213_s11 }
 0x233   : > { %p1836_p6 = scmp.eq.s32.totalorder %s804_s4, 0 }
 0x234   : > { %s809_s30 = sld [smem:[#allocation7 + %s3207_s5]] (!%p1836_p6)  ;;  %v2418_v26 = vld [vmem:[%s3187_s29] sm:$0xff] (!%p1836_p6)   ;;  %v2420_v36 = vld [vmem:[%s3187_s29 + $0x8] sm:$0xff] (!%p1836_p6)   ;;  %v2422_v38 = vld [vmem:[%s3187_s29 + $0x10] sm:$0xff] (!%p1836_p6)  }
 0x235   : > { %808 = sbr.rel (%p1836_p6) target bundleno = 833 (0x341), region = 92  ;;  %v2419_v27 = vld [vmem:[%s3187_s29 + $0x20] sm:$0xff] (!%p1836_p6)   ;;  %2117 = vmatprep.mubr.bf16.mxu0 (!%p1836_p6), %v2418_v26  ;;  %v2421_v37 = vld [vmem:[%s3187_s29 + $0x28] sm:$0xff] (!%p1836_p6)   ;;  %v2423_v39 = vld [vmem:[%s3187_s29 + $0x30] sm:$0xff] (!%p1836_p6)  }
 0x236   : > { %2125 = vmatprep.mubr.bf16.mxu1 (!%p1836_p6), %v2419_v27  ;;  %v2424_v40 = vld [vmem:[%s3187_s29 + $0x18] sm:$0xff] (!%p1836_p6)   ;;  %v833_v42 = vld [vmem:[#allocation2 + $0x10] sm:$0xff] (!%p1836_p6)  ;;  %v831_v44 = vld [vmem:[#allocation2] sm:$0xff] (!%p1836_p6) }
 0x237   : > { %v2425_v41 = vld [vmem:[%s3187_s29 + $0x38] sm:$0xff] (!%p1836_p6)   ;;  %v841_v43 = vld [vmem:[#allocation2 + $0x50] sm:$0xff] (!%p1836_p6)  ;;  %v839_v45 = vld [vmem:[#allocation2 + $0x40] sm:$0xff] (!%p1836_p6) }
 0x238   : > { %v834_v48 = vld [vmem:[#allocation2 + $0x18] sm:$0xff] (!%p1836_p6)  ;;  %v832_v54 = vld [vmem:[#allocation2 + $0x8] sm:$0xff] (!%p1836_p6)  ;;  %v837_v2 = vld [vmem:[#allocation2 + $0x30] sm:$0xff] (!%p1836_p6) }
 0x239   : > { %v842_v49 = vld [vmem:[#allocation2 + $0x58] sm:$0xff] (!%p1836_p6)  ;;  %v840_v55 = vld [vmem:[#allocation2 + $0x48] sm:$0xff] (!%p1836_p6)  ;;  %v845_v3 = vld [vmem:[#allocation2 + $0x70] sm:$0xff] (!%p1836_p6) }
 0x23a   : > { %s1837_s15 = sshll.u32 (!%p1836_p6), %s809_s30, 7  ;;  %v835_v4 = vld [vmem:[#allocation2 + $0x20] sm:$0xff] (!%p1836_p6)  ;;  %v838_v8 = vld [vmem:[#allocation2 + $0x38] sm:$0xff] (!%p1836_p6)  ;;  %v836_v14 = vld [vmem:[#allocation2 + $0x28] sm:$0xff] (!%p1836_p6) }
 0x23b   : > { %s811_s24 = sshra.s32 (!%p1836_p6), %s1837_s15, 3  ;;  %v843_v5 = vld [vmem:[#allocation2 + $0x60] sm:$0xff] (!%p1836_p6)  ;;  %v846_v9 = vld [vmem:[#allocation2 + $0x78] sm:$0xff] (!%p1836_p6)  ;;  %v844_v15 = vld [vmem:[#allocation2 + $0x68] sm:$0xff] (!%p1836_p6) }
 0x23c   : > { %s1838_s12 = sshll.u32 %s811_s24, 2 }
 0x23d   : > { %s3241_s9 = scalar_lea.vmem [#allocation13], %s1838_s12 }
 0x23e   : > { %v2410_v28 = vld [vmem:[%s3241_s9] sm:$0xff]   ;;  %v2411_v29 = vld [vmem:[%s3241_s9 + $0x8] sm:$0xff]   ;;  %v2412_v30 = vld [vmem:[%s3241_s9 + $0x10] sm:$0xff]  }
 0x23f   : > { %2101 = vmatprep.subr.bf16.mxu0 %v2410_v28  ;;  %2213 = vmatprep.subr.bf16.mxu1 %v2410_v28  ;;  %v2413_v31 = vld [vmem:[%s3241_s9 + $0x18] sm:$0xff]   ;;  %v2414_v32 = vld [vmem:[%s3241_s9 + $0x20] sm:$0xff]   ;;  %v2415_v33 = vld [vmem:[%s3241_s9 + $0x28] sm:$0xff]  }
 0x240   : > { %2102 = vmatpush3.bf16.msra.mxu0 %v2410_v28  ;;  %2221 = vmatpush3.bf16.msra.mxu1 %v2410_v28  ;;  %v2416_v34 = vld [vmem:[%s3241_s9 + $0x30] sm:$0xff]   ;;  %v2417_v35 = vld [vmem:[%s3241_s9 + $0x38] sm:$0xff]  }
 0x241   : > { %2103 = vmatprep.subr.bf16.mxu0 %v2411_v29  ;;  %2214 = vmatprep.subr.bf16.mxu1 %v2411_v29 }
 0x244   : > { %2104 = vmatpush3.bf16.msra.mxu0 %v2411_v29  ;;  %2222 = vmatpush3.bf16.msra.mxu1 %v2411_v29 }
 0x245   : > { %2105 = vmatprep.subr.bf16.mxu0 %v2412_v30  ;;  %2215 = vmatprep.subr.bf16.mxu1 %v2412_v30 }
 0x248   : > { %2106 = vmatpush3.bf16.msra.mxu0 %v2412_v30  ;;  %2223 = vmatpush3.bf16.msra.mxu1 %v2412_v30 }
 0x249   : > { %2107 = vmatprep.subr.bf16.mxu0 %v2413_v31  ;;  %2216 = vmatprep.subr.bf16.mxu1 %v2413_v31 }
 0x24c   : > { %2108 = vmatpush3.bf16.msra.mxu0 %v2413_v31  ;;  %2224 = vmatpush3.bf16.msra.mxu1 %v2413_v31 }
 0x24d   : > { %2109 = vmatprep.subr.bf16.mxu0 %v2414_v32  ;;  %2217 = vmatprep.subr.bf16.mxu1 %v2414_v32 }
 0x250   : > { %2110 = vmatpush3.bf16.msra.mxu0 %v2414_v32  ;;  %2225 = vmatpush3.bf16.msra.mxu1 %v2414_v32 }
 0x251   : > { %2111 = vmatprep.subr.bf16.mxu0 %v2415_v33  ;;  %2218 = vmatprep.subr.bf16.mxu1 %v2415_v33 }
 0x254   : > { %2112 = vmatpush3.bf16.msra.mxu0 %v2415_v33  ;;  %2226 = vmatpush3.bf16.msra.mxu1 %v2415_v33 }
 0x255   : > { %2113 = vmatprep.subr.bf16.mxu0 %v2416_v34  ;;  %2219 = vmatprep.subr.bf16.mxu1 %v2416_v34 }
 0x258   : > { %2114 = vmatpush3.bf16.msra.mxu0 %v2416_v34  ;;  %2227 = vmatpush3.bf16.msra.mxu1 %v2416_v34 }
 0x259   : > { %2115 = vmatprep.subr.bf16.mxu0 %v2417_v35  ;;  %2220 = vmatprep.subr.bf16.mxu1 %v2417_v35 }
 0x25c   : > { %2116 = vmatpush3.bf16.msra.mxu0 %v2417_v35  ;;  %2228 = vmatpush3.bf16.msra.mxu1 %v2417_v35 }
 0x25f   : > { %2118 = vmatmul.mubr.bf16.vlgmr.msra.gmra.mrb[0].mxu0 %v2420_v36  ;;  %2126 = vmatmul.mubr.bf16.vlgmr.msra.gmra.mrb[0].mxu1 %v2421_v37 }
 0x260   : > { %2121 = vmatprep.mubr.bf16.mxu0 %v2422_v38  ;;  %2129 = vmatprep.mubr.bf16.mxu1 %v2423_v39 }
 0x267   : > { %2122 = vmatmul.mubr.bf16.gmra.mrb[4].mxu0 %v2424_v40  ;;  %2130 = vmatmul.mubr.bf16.gmra.mrb[4].mxu1 %v2425_v41 }
 0x332   : > { %v2119_v46 = vpop.f32.mrb[0].mxu0  ;;  %v2127_v47 = vpop.f32.mrb[0].mxu1 }
 0x333   : > { %v1058_v50 = vadd.f32 %v2119_v46, %v833_v42  ;;  %v1066_v51 = vadd.f32 %v2127_v47, %v841_v43  ;;  %v993_v52 = vpop.f32.mrb[1].mxu0  ;;  %v1025_v53 = vpop.f32.mrb[1].mxu1 }
 0x334   : > { %v1056_v56 = vadd.f32 %v993_v52, %v831_v44  ;;  %v1064_v57 = vadd.f32 %v1025_v53, %v839_v45  ;;  %v2120_v58 = vpop.f32.mrb[2].mxu0  ;;  %v2128_v59 = vpop.f32.mrb[2].mxu1 }
 0x335   : > { %1074 = vst [vmem:[#allocation2 + $0x10] sm:$0xff] %v1058_v50  ;;  %1082 = vst [vmem:[#allocation2 + $0x50] sm:$0xff] %v1066_v51  ;;  %v1059_v60 = vadd.f32 %v2120_v58, %v834_v48  ;;  %v1067_v61 = vadd.f32 %v2128_v59, %v842_v49  ;;  %v996_v62 = vpop.f32.mrb[3].mxu0  ;;  %v1028_v63 = vpop.f32.mrb[3].mxu1 }
 0x336   : > { %1072 = vst [vmem:[#allocation2] sm:$0xff] %v1056_v56  ;;  %1080 = vst [vmem:[#allocation2 + $0x40] sm:$0xff] %v1064_v57  ;;  %v1057_v0 = vadd.f32 %v996_v62, %v832_v54  ;;  %v1065_v1 = vadd.f32 %v1028_v63, %v840_v55 }
 0x337   : > { %1075 = vst [vmem:[#allocation2 + $0x18] sm:$0xff] %v1059_v60  ;;  %1083 = vst [vmem:[#allocation2 + $0x58] sm:$0xff] %v1067_v61 }
 0x338   : > { %1073 = vst [vmem:[#allocation2 + $0x8] sm:$0xff] %v1057_v0  ;;  %1081 = vst [vmem:[#allocation2 + $0x48] sm:$0xff] %v1065_v1 }
 0x33a   : > { %v2123_v6 = vpop.f32.mrb[4].mxu0  ;;  %v2131_v7 = vpop.f32.mrb[4].mxu1 }
 0x33b   : > { %v1062_v10 = vadd.f32 %v2123_v6, %v837_v2  ;;  %v1070_v11 = vadd.f32 %v2131_v7, %v845_v3  ;;  %v1009_v12 = vpop.f32.mrb[5].mxu0  ;;  %v1041_v13 = vpop.f32.mrb[5].mxu1 }
 0x33c   : > { %v1060_v16 = vadd.f32 %v1009_v12, %v835_v4  ;;  %v1068_v17 = vadd.f32 %v1041_v13, %v843_v5  ;;  %v2124_v18 = vpop.f32.mrb[6].mxu0  ;;  %v2132_v19 = vpop.f32.mrb[6].mxu1 }
 0x33d   : > { %1078 = vst [vmem:[#allocation2 + $0x30] sm:$0xff] %v1062_v10  ;;  %1086 = vst [vmem:[#allocation2 + $0x70] sm:$0xff] %v1070_v11  ;;  %v1063_v20 = vadd.f32 %v2124_v18, %v838_v8  ;;  %v1071_v21 = vadd.f32 %v2132_v19, %v846_v9  ;;  %v1012_v22 = vpop.f32.mrb[7].mxu0  ;;  %v1044_v23 = vpop.f32.mrb[7].mxu1 }
 0x33e   : > { %1076 = vst [vmem:[#allocation2 + $0x20] sm:$0xff] %v1060_v16  ;;  %1084 = vst [vmem:[#allocation2 + $0x60] sm:$0xff] %v1068_v17  ;;  %v1061_v24 = vadd.f32 %v1012_v22, %v836_v14  ;;  %v1069_v25 = vadd.f32 %v1044_v23, %v844_v15 }
 0x33f   : > { %1079 = vst [vmem:[#allocation2 + $0x38] sm:$0xff] %v1063_v20  ;;  %1087 = vst [vmem:[#allocation2 + $0x78] sm:$0xff] %v1071_v21 }
 0x340   : > { %1077 = vst [vmem:[#allocation2 + $0x28] sm:$0xff] %v1061_v24  ;;  %1085 = vst [vmem:[#allocation2 + $0x68] sm:$0xff] %v1069_v25 }
 0x341 PF: > { %s1088_s29 = sand.u32 4, %s3213_s11 }
 0x342   : > { %p1855_p4 = scmp.eq.s32.totalorder %s1088_s29, 0 }
 0x343   : > { %s1900_s5 = sshll.u32 (!%p1855_p4), %s3210_s16, 6  ;;  %v1093_v26 = vld [vmem:[#allocation2] sm:$0xff] (!%p1855_p4)  ;;  %v1094_v27 = vld [vmem:[#allocation2 + $0x8] sm:$0xff] (!%p1855_p4)  ;;  %v1095_v42 = vld [vmem:[#allocation2 + $0x10] sm:$0xff] (!%p1855_p4)  ;;  %s3461_s10 = sld [smem:[#allocation41_spill]] (!%p1855_p4) }
 0x344   : > { %1092 = sbr.rel (%p1855_p4) target bundleno = 1336 (0x538), region = 96  ;;  %v1109_v28 = vpack.c.bf16 (!%p1855_p4), %v1094_v27, %v1093_v26  ;;  %s3259_s13 = scalar_lea.vmem (!%p1855_p4), [#allocation17], %s1900_s5  ;;  %v1096_v43 = vld [vmem:[#allocation2 + $0x18] sm:$0xff] (!%p1855_p4)  ;;  %v1099_v49 = vld [vmem:[#allocation2 + $0x30] sm:$0xff] (!%p1855_p4)  ;;  %v1101_v51 = vld [vmem:[#allocation2 + $0x40] sm:$0xff] (!%p1855_p4) }
 0x345   : > { %v2426_v29 = vld [vmem:[%s3259_s13] sm:$0xff] (!%p1855_p4)   ;;  %v2427_v30 = vld [vmem:[%s3259_s13 + $0x8] sm:$0xff] (!%p1855_p4)   ;;  %v2428_v31 = vld [vmem:[%s3259_s13 + $0x10] sm:$0xff] (!%p1855_p4)   ;;  %s3266_s11 = scalar_lea.vmem (!%p1855_p4), [#allocation19], %s1900_s5  ;;  %v1110_v47 = vpack.c.bf16 (!%p1855_p4), %v1096_v43, %v1095_v42  ;;  %s3462_s8 = sld [smem:[#allocation43_spill]] (!%p1855_p4) }
 0x346   : > { %2149 = vmatprep.mubr.bf16.mxu0 (!%p1855_p4), %v1109_v28  ;;  %2133 = vmatprep.subr.bf16.mxu0 (!%p1855_p4), %v2426_v29  ;;  %v2429_v32 = vld [vmem:[%s3259_s13 + $0x18] sm:$0xff] (!%p1855_p4)   ;;  %v2430_v33 = vld [vmem:[%s3259_s13 + $0x20] sm:$0xff] (!%p1855_p4)   ;;  %v2435_v35 = vld [vmem:[%s3266_s11 + $0x8] sm:$0xff] (!%p1855_p4)  }
 0x347   : > { %2134 = vmatpush3.bf16.msra.mxu0 (!%p1855_p4), %v2426_v29  ;;  %v2434_v34 = vld [vmem:[%s3266_s11] sm:$0xff] (!%p1855_p4)   ;;  %v2431_v36 = vld [vmem:[%s3259_s13 + $0x28] sm:$0xff] (!%p1855_p4)   ;;  %v2436_v37 = vld [vmem:[%s3266_s11 + $0x10] sm:$0xff] (!%p1855_p4)  }
 0x348   : > { %2135 = vmatprep.subr.bf16.mxu0 (!%p1855_p4), %v2427_v30  ;;  %2165 = vmatprep.subr.bf16.mxu1 (!%p1855_p4), %v2434_v34  ;;  %v2432_v38 = vld [vmem:[%s3259_s13 + $0x30] sm:$0xff] (!%p1855_p4)   ;;  %v2437_v39 = vld [vmem:[%s3266_s11 + $0x18] sm:$0xff] (!%p1855_p4)   ;;  %v2438_v41 = vld [vmem:[%s3266_s11 + $0x20] sm:$0xff] (!%p1855_p4)  }
 0x349   : > { %2166 = vmatpush3.bf16.msra.mxu1 (!%p1855_p4), %v2434_v34  ;;  %v2433_v40 = vld [vmem:[%s3259_s13 + $0x38] sm:$0xff] (!%p1855_p4)   ;;  %v1097_v44 = vld [vmem:[#allocation2 + $0x20] sm:$0xff] (!%p1855_p4)  ;;  %v2439_v46 = vld [vmem:[%s3266_s11 + $0x28] sm:$0xff] (!%p1855_p4)   ;;  %s1136_s2 = scalar_lea.vmem (!%p1855_p4), %s3461_s10, %s3210_s16 }
 0x34a   : > { %2167 = vmatprep.subr.bf16.mxu1 (!%p1855_p4), %v2435_v35  ;;  %v1098_v45 = vld [vmem:[#allocation2 + $0x28] sm:$0xff] (!%p1855_p4)  ;;  %v1100_v50 = vld [vmem:[#allocation2 + $0x38] sm:$0xff] (!%p1855_p4)  ;;  %v1103_v55 = vld [vmem:[#allocation2 + $0x50] sm:$0xff] (!%p1855_p4) }
 0x34b   : > { %2136 = vmatpush3.bf16.msra.mxu0 %v2427_v30  ;;  %v1111_v48 = vpack.c.bf16 %v1098_v45, %v1097_v44  ;;  %v1102_v52 = vld [vmem:[#allocation2 + $0x48] sm:$0xff]  ;;  %v1112_v53 = vpack.c.bf16 %v1100_v50, %v1099_v49  ;;  %v1104_v56 = vld [vmem:[#allocation2 + $0x58] sm:$0xff]  ;;  %v1105_v57 = vld [vmem:[#allocation2 + $0x60] sm:$0xff]  ;;  %s1331_s4 = scalar_lea.vmem %s3462_s8, %s3210_s16 }
 0x34c   : > { %2137 = vmatprep.subr.bf16.mxu0 %v2428_v31  ;;  %v1113_v54 = vpack.c.bf16 %v1102_v52, %v1101_v51  ;;  %v1106_v58 = vld [vmem:[#allocation2 + $0x68] sm:$0xff]  ;;  %v1114_v59 = vpack.c.bf16 %v1104_v56, %v1103_v55  ;;  %v1107_v61 = vld [vmem:[#allocation2 + $0x70] sm:$0xff]  ;;  %v1108_v62 = vld [vmem:[#allocation2 + $0x78] sm:$0xff] }
 0x34d   : > { %2168 = vmatpush3.bf16.msra.mxu1 %v2435_v35  ;;  %v1115_v60 = vpack.c.bf16 %v1106_v58, %v1105_v57  ;;  %v1116_v63 = vpack.c.bf16 %v1108_v62, %v1107_v61  ;;  %v2440_v0 = vld [vmem:[%s3266_s11 + $0x30] sm:$0xff]   ;;  %v2441_v1 = vld [vmem:[%s3266_s11 + $0x38] sm:$0xff]   ;;  %v1858_v2 = vld [vmem:[%s1136_s2] ss:$0 sm:$0xff] }
 0x34e   : > { %2169 = vmatprep.subr.bf16.mxu1 %v2436_v37  ;;  %v1486_v61 = vld [vmem:[#allocation3 + $0x10] sm:$0xff] }
 0x34f   : > { %2138 = vmatpush3.bf16.msra.mxu0 %v2428_v31 }
 0x350   : > { %2139 = vmatprep.subr.bf16.mxu0 %v2429_v32 }
 0x351   : > { %2170 = vmatpush3.bf16.msra.mxu1 %v2436_v37 }
 0x352   : > { %2171 = vmatprep.subr.bf16.mxu1 %v2437_v39 }
 0x353   : > { %2140 = vmatpush3.bf16.msra.mxu0 %v2429_v32 }
 0x354   : > { %2141 = vmatprep.subr.bf16.mxu0 %v2430_v33 }
 0x355   : > { %2172 = vmatpush3.bf16.msra.mxu1 %v2437_v39 }
 0x356   : > { %2173 = vmatprep.subr.bf16.mxu1 %v2438_v41 }
 0x357   : > { %2142 = vmatpush3.bf16.msra.mxu0 %v2430_v33 }
 0x358   : > { %2143 = vmatprep.subr.bf16.mxu0 %v2431_v36 }
 0x359   : > { %2174 = vmatpush3.bf16.msra.mxu1 %v2438_v41 }
 0x35a   : > { %2175 = vmatprep.subr.bf16.mxu1 %v2439_v46 }
 0x35b   : > { %2144 = vmatpush3.bf16.msra.mxu0 %v2431_v36 }
 0x35c   : > { %2145 = vmatprep.subr.bf16.mxu0 %v2432_v38 }
 0x35d   : > { %2176 = vmatpush3.bf16.msra.mxu1 %v2439_v46 }
 0x35e   : > { %2177 = vmatprep.subr.bf16.mxu1 %v2440_v0 }
 0x35f   : > { %2146 = vmatpush3.bf16.msra.mxu0 %v2432_v38 }
 0x360   : > { %2147 = vmatprep.subr.bf16.mxu0 %v2433_v40 }
 0x361   : > { %2178 = vmatpush3.bf16.msra.mxu1 %v2440_v0  ;;  %v1484_v0 = vld [vmem:[#allocation3] sm:$0xff] }
 0x362   : > { %2179 = vmatprep.subr.bf16.mxu1 %v2441_v1 }
 0x363   : > { %2148 = vmatpush3.bf16.msra.mxu0 %v2433_v40 }
 0x365   : > { %2180 = vmatpush3.bf16.msra.mxu1 %v2441_v1 }
 0x366   : > { %2150 = vmatmul.mubr.bf16.vlgmr.msra.gmra.mrb[0].mxu0 %v1110_v47 }
 0x367   : > { %2153 = vmatprep.mubr.bf16.mxu0 %v1111_v48 }
 0x36e   : > { %2154 = vmatmul.mubr.bf16.gmra.mrb[4].mxu0 %v1112_v53 }
 0x36f   : > { %2157 = vmatprep.mubr.bf16.mxu0 %v1113_v54 }
 0x376   : > { %2158 = vmatmul.mubr.bf16.gmra.mrb[8].mxu0 %v1114_v59  ;;  %v3287_v59 = vld [vmem:[%s1331_s4] ss:$0 sm:$0xff] }
 0x377   : > { %2161 = vmatprep.mubr.bf16.mxu0 %v1115_v60 }
 0x37e   : > { %2162 = vmatmul.mubr.bf16.gmra.mrb[12].mxu0 %v1116_v63 }
 0x439   : > { %v2151_v3 = vpop.f32.mrb[0].mxu0 }
 0x43a   : > { %v1235_v4 = vadd.f32 %v2151_v3, %v1858_v2  ;;  %v1226_v5 = vpop.f32.mrb[1].mxu0  ;;  %v1487_v3 = vld [vmem:[#allocation3 + $0x18] sm:$0xff] }
 0x43b   : > { %v1227_v6 = vadd.f32 %v1858_v2, %v1226_v5  ;;  %v2152_v7 = vpop.f32.mrb[2].mxu0 }
 0x43c   : > { %v1238_v8 = vadd.f32 %v2152_v7, %v1858_v2  ;;  %v1229_v9 = vpop.f32.mrb[3].mxu0  ;;  %v1291_v11 = vmax.f32 %v1235_v4, 0.0  ;;  %v1485_v7 = vld [vmem:[#allocation3 + $0x8] sm:$0xff] }
 0x43d   : > { %v1230_v10 = vadd.f32 %v1858_v2, %v1229_v9  ;;  %v1289_v13 = vmax.f32 %v1227_v6, 0.0 }
 0x43e   : > { %v1292_v12 = vmax.f32 %v1238_v8, 0.0 }
 0x43f   : > { %v1290_v14 = vmax.f32 %v1230_v10, 0.0 }
 0x440   : > { %v1306_v15 = vpack.c.bf16 %v1292_v12, %v1291_v11 }
 0x441   : > { %v2155_v16 = vpop.f32.mrb[4].mxu0  ;;  %v1305_v17 = vpack.c.bf16 %v1290_v14, %v1289_v13  ;;  %v1490_v13 = vld [vmem:[#allocation3 + $0x30] sm:$0xff] }
 0x442   : > { %v1251_v18 = vadd.f32 %v2155_v16, %v1858_v2  ;;  %v1242_v19 = vpop.f32.mrb[5].mxu0  ;;  %v1488_v16 = vld [vmem:[#allocation3 + $0x20] sm:$0xff] }
 0x443   : > { %v1243_v20 = vadd.f32 %v1858_v2, %v1242_v19  ;;  %v2156_v21 = vpop.f32.mrb[6].mxu0  ;;  %2181 = vmatprep.mubr.bf16.mxu1 %v1305_v17  ;;  %v1491_v19 = vld [vmem:[#allocation3 + $0x38] sm:$0xff] }
 0x444   : > { %v1254_v22 = vadd.f32 %v2156_v21, %v1858_v2  ;;  %v1245_v23 = vpop.f32.mrb[7].mxu0  ;;  %2182 = vmatmul.mubr.bf16.vlgmr.msra.gmra.mrb[0].mxu1 %v1306_v15  ;;  %v1295_v25 = vmax.f32 %v1251_v18, 0.0 }
 0x445   : > { %v1246_v24 = vadd.f32 %v1858_v2, %v1245_v23  ;;  %v1293_v27 = vmax.f32 %v1243_v20, 0.0  ;;  %v1489_v23 = vld [vmem:[#allocation3 + $0x28] sm:$0xff] }
 0x446   : > { %v1296_v26 = vmax.f32 %v1254_v22, 0.0 }
 0x447   : > { %v1294_v28 = vmax.f32 %v1246_v24, 0.0 }
 0x448   : > { %v1308_v29 = vpack.c.bf16 %v1296_v26, %v1295_v25 }
 0x449   : > { %v1307_v30 = vpack.c.bf16 %v1294_v28, %v1293_v27  ;;  %v2159_v31 = vpop.f32.mrb[8].mxu0 }
 0x44a   : > { %v1267_v32 = vadd.f32 %v2159_v31, %v1858_v2  ;;  %v1258_v33 = vpop.f32.mrb[9].mxu0 }
 0x44b   : > { %v1259_v34 = vadd.f32 %v1858_v2, %v1258_v33  ;;  %v2160_v35 = vpop.f32.mrb[10].mxu0  ;;  %2185 = vmatprep.mubr.bf16.mxu1 %v1307_v30 }
 0x44c   : > { %v1270_v36 = vadd.f32 %v2160_v35, %v1858_v2  ;;  %v1261_v37 = vpop.f32.mrb[11].mxu0  ;;  %2186 = vmatmul.mubr.bf16.gmra.mrb[4].mxu1 %v1308_v29  ;;  %v1299_v39 = vmax.f32 %v1267_v32, 0.0  ;;  %v1494_v29 = vld [vmem:[#allocation3 + $0x50] sm:$0xff]  ;;  %v1492_v32 = vld [vmem:[#allocation3 + $0x40] sm:$0xff]  ;;  %v1495_v35 = vld [vmem:[#allocation3 + $0x58] sm:$0xff] }
 0x44d   : > { %v1262_v38 = vadd.f32 %v1858_v2, %v1261_v37  ;;  %v1297_v41 = vmax.f32 %v1259_v34, 0.0 }
 0x44e   : > { %v1300_v40 = vmax.f32 %v1270_v36, 0.0 }
 0x44f   : > { %v1298_v42 = vmax.f32 %v1262_v38, 0.0 }
 0x450   : > { %v1310_v43 = vpack.c.bf16 %v1300_v40, %v1299_v39  ;;  %v1493_v39 = vld [vmem:[#allocation3 + $0x48] sm:$0xff] }
 0x451   : > { %v1309_v44 = vpack.c.bf16 %v1298_v42, %v1297_v41  ;;  %v2163_v45 = vpop.f32.mrb[12].mxu0 }
 0x452   : > { %v1283_v46 = vadd.f32 %v2163_v45, %v1858_v2  ;;  %v1274_v47 = vpop.f32.mrb[13].mxu0  ;;  %v1498_v45 = vld [vmem:[#allocation3 + $0x70] sm:$0xff] }
 0x453   : > { %v1275_v48 = vadd.f32 %v1858_v2, %v1274_v47  ;;  %v2164_v49 = vpop.f32.mrb[14].mxu0  ;;  %2189 = vmatprep.mubr.bf16.mxu1 %v1309_v44 }
 0x454   : > { %v1286_v50 = vadd.f32 %v2164_v49, %v1858_v2  ;;  %v1277_v51 = vpop.f32.mrb[15].mxu0  ;;  %2190 = vmatmul.mubr.bf16.gmra.mrb[8].mxu1 %v1310_v43  ;;  %v1303_v53 = vmax.f32 %v1283_v46, 0.0 }
 0x455   : > { %v1278_v52 = vadd.f32 %v1858_v2, %v1277_v51  ;;  %v1301_v55 = vmax.f32 %v1275_v48, 0.0  ;;  %v1496_v48 = vld [vmem:[#allocation3 + $0x60] sm:$0xff]  ;;  %v1499_v51 = vld [vmem:[#allocation3 + $0x78] sm:$0xff] }
 0x456   : > { %v1304_v54 = vmax.f32 %v1286_v50, 0.0 }
 0x457   : > { %v1302_v56 = vmax.f32 %v1278_v52, 0.0 }
 0x458   : > { %v1312_v57 = vpack.c.bf16 %v1304_v54, %v1303_v53 }
 0x459   : > { %v1311_v58 = vpack.c.bf16 %v1302_v56, %v1301_v55  ;;  %v1497_v55 = vld [vmem:[#allocation3 + $0x68] sm:$0xff] }
 0x45b   : > { %2193 = vmatprep.mubr.bf16.mxu1 %v1311_v58 }
 0x45c   : > { %2194 = vmatmul.mubr.bf16.gmra.mrb[12].mxu1 %v1312_v57 }
 0x517   : > { %v2183_v60 = vpop.f32.mrb[0].mxu1 }
 0x518   : > { %v1430_v62 = vadd.f32 %v2183_v60, %v3287_v59  ;;  %v1421_v63 = vpop.f32.mrb[1].mxu1 }
 0x519   : > { %v1422_v1 = vadd.f32 %v3287_v59, %v1421_v63  ;;  %v2184_v2 = vpop.f32.mrb[2].mxu1 }
 0x51a   : > { %v1502_v4 = vadd.f32 %v1486_v61, %v1430_v62  ;;  %v1433_v5 = vadd.f32 %v2184_v2, %v3287_v59  ;;  %v1424_v6 = vpop.f32.mrb[3].mxu1 }
 0x51b   : > { %v1500_v8 = vadd.f32 %v1484_v0, %v1422_v1  ;;  %v1425_v9 = vadd.f32 %v3287_v59, %v1424_v6 }
 0x51c   : > { %1518 = vst [vmem:[#allocation3 + $0x10] sm:$0xff] %v1502_v4  ;;  %v1503_v10 = vadd.f32 %v1487_v3, %v1433_v5 }
 0x51d   : > { %1516 = vst [vmem:[#allocation3] sm:$0xff] %v1500_v8  ;;  %v1501_v11 = vadd.f32 %v1485_v7, %v1425_v9 }
 0x51e   : > { %1519 = vst [vmem:[#allocation3 + $0x18] sm:$0xff] %v1503_v10 }
 0x51f   : > { %1517 = vst [vmem:[#allocation3 + $0x8] sm:$0xff] %v1501_v11  ;;  %v2187_v12 = vpop.f32.mrb[4].mxu1 }
 0x520   : > { %v1446_v14 = vadd.f32 %v2187_v12, %v3287_v59  ;;  %v1437_v15 = vpop.f32.mrb[5].mxu1 }
 0x521   : > { %v1438_v17 = vadd.f32 %v3287_v59, %v1437_v15  ;;  %v2188_v18 = vpop.f32.mrb[6].mxu1 }
 0x522   : > { %v1506_v20 = vadd.f32 %v1490_v13, %v1446_v14  ;;  %v1449_v21 = vadd.f32 %v2188_v18, %v3287_v59  ;;  %v1440_v22 = vpop.f32.mrb[7].mxu1 }
 0x523   : > { %v1504_v24 = vadd.f32 %v1488_v16, %v1438_v17  ;;  %v1441_v25 = vadd.f32 %v3287_v59, %v1440_v22 }
 0x524   : > { %1522 = vst [vmem:[#allocation3 + $0x30] sm:$0xff] %v1506_v20  ;;  %v1507_v26 = vadd.f32 %v1491_v19, %v1449_v21 }
 0x525   : > { %1520 = vst [vmem:[#allocation3 + $0x20] sm:$0xff] %v1504_v24  ;;  %v1505_v27 = vadd.f32 %v1489_v23, %v1441_v25 }
 0x526   : > { %1523 = vst [vmem:[#allocation3 + $0x38] sm:$0xff] %v1507_v26 }
 0x527   : > { %1521 = vst [vmem:[#allocation3 + $0x28] sm:$0xff] %v1505_v27  ;;  %v2191_v28 = vpop.f32.mrb[8].mxu1 }
 0x528   : > { %v1462_v30 = vadd.f32 %v2191_v28, %v3287_v59  ;;  %v1453_v31 = vpop.f32.mrb[9].mxu1 }
 0x529   : > { %v1454_v33 = vadd.f32 %v3287_v59, %v1453_v31  ;;  %v2192_v34 = vpop.f32.mrb[10].mxu1 }
 0x52a   : > { %v1510_v36 = vadd.f32 %v1494_v29, %v1462_v30  ;;  %v1465_v37 = vadd.f32 %v2192_v34, %v3287_v59  ;;  %v1456_v38 = vpop.f32.mrb[11].mxu1 }
 0x52b   : > { %v1508_v40 = vadd.f32 %v1492_v32, %v1454_v33  ;;  %v1457_v41 = vadd.f32 %v3287_v59, %v1456_v38 }
 0x52c   : > { %1526 = vst [vmem:[#allocation3 + $0x50] sm:$0xff] %v1510_v36  ;;  %v1511_v42 = vadd.f32 %v1495_v35, %v1465_v37 }
 0x52d   : > { %1524 = vst [vmem:[#allocation3 + $0x40] sm:$0xff] %v1508_v40  ;;  %v1509_v43 = vadd.f32 %v1493_v39, %v1457_v41 }
 0x52e   : > { %1527 = vst [vmem:[#allocation3 + $0x58] sm:$0xff] %v1511_v42 }
 0x52f   : > { %1525 = vst [vmem:[#allocation3 + $0x48] sm:$0xff] %v1509_v43  ;;  %v2195_v44 = vpop.f32.mrb[12].mxu1 }
 0x530   : > { %v1478_v46 = vadd.f32 %v2195_v44, %v3287_v59  ;;  %v1469_v47 = vpop.f32.mrb[13].mxu1 }
 0x531   : > { %v1470_v49 = vadd.f32 %v3287_v59, %v1469_v47  ;;  %v2196_v50 = vpop.f32.mrb[14].mxu1 }
 0x532   : > { %v1514_v52 = vadd.f32 %v1498_v45, %v1478_v46  ;;  %v1481_v53 = vadd.f32 %v2196_v50, %v3287_v59  ;;  %v1472_v54 = vpop.f32.mrb[15].mxu1 }
 0x533   : > { %v1512_v56 = vadd.f32 %v1496_v48, %v1470_v49  ;;  %v1473_v57 = vadd.f32 %v3287_v59, %v1472_v54 }
 0x534   : > { %1530 = vst [vmem:[#allocation3 + $0x70] sm:$0xff] %v1514_v52  ;;  %v1515_v58 = vadd.f32 %v1499_v51, %v1481_v53 }
 0x535   : > { %1528 = vst [vmem:[#allocation3 + $0x60] sm:$0xff] %v1512_v56  ;;  %v1513_v60 = vadd.f32 %v1497_v55, %v1473_v57 }
 0x536   : > { %1531 = vst [vmem:[#allocation3 + $0x78] sm:$0xff] %v1515_v58 }
 0x537   : > { %1529 = vst [vmem:[#allocation3 + $0x68] sm:$0xff] %v1513_v60 }
 0x538 PF: > { %s3463_s16 = sld [smem:[#allocation31_spill]] }
 0x53e   : > { %p1877_p11 = scmp.ne.s32.totalorder %s3463_s16, 5 }
 0x53f   : > { %v1536_v61 = vld [vmem:[#allocation3] sm:$0xff] (!%p1877_p11)  ;;  %v1537_v62 = vld [vmem:[#allocation3 + $0x8] sm:$0xff] (!%p1877_p11)  ;;  %v1538_v63 = vld [vmem:[#allocation3 + $0x10] sm:$0xff] (!%p1877_p11) }
 0x540   : > { %1535 = sbr.rel (%p1877_p11) target bundleno = 1352 (0x548), region = 100  ;;  %v1954_v0 = vpack.c.bf16 (!%p1877_p11), %v1537_v62, %v1536_v61  ;;  %v1539_v1 = vld [vmem:[#allocation3 + $0x18] sm:$0xff] (!%p1877_p11)  ;;  %v1540_v2 = vld [vmem:[#allocation3 + $0x20] sm:$0xff] (!%p1877_p11)  ;;  %v1541_v59 = vld [vmem:[#allocation3 + $0x28] sm:$0xff] (!%p1877_p11) }
 0x541   : > { %v1959_v3 = vpack.c.bf16 (!%p1877_p11), %v1539_v1, %v1538_v63  ;;  %v1964_v4 = vpack.c.bf16 (!%p1877_p11), %v1541_v59, %v1540_v2  ;;  %v1542_v5 = vld [vmem:[#allocation3 + $0x30] sm:$0xff] (!%p1877_p11)  ;;  %v1543_v6 = vld [vmem:[#allocation3 + $0x38] sm:$0xff] (!%p1877_p11)  ;;  %v1544_v7 = vld [vmem:[#allocation3 + $0x40] sm:$0xff] (!%p1877_p11) }
 0x542   : > { %1955 = vst [vmem:[%s3215_s27] sm:$0xff] (!%p1877_p11), %v1954_v0   ;;  %v1969_v8 = vpack.c.bf16 (!%p1877_p11), %v1543_v6, %v1542_v5  ;;  %v1545_v9 = vld [vmem:[#allocation3 + $0x48] sm:$0xff] (!%p1877_p11)  ;;  %v1546_v10 = vld [vmem:[#allocation3 + $0x50] sm:$0xff] (!%p1877_p11)  ;;  %v1547_v11 = vld [vmem:[#allocation3 + $0x58] sm:$0xff] (!%p1877_p11) }
 0x543   : > { %1998 = vst [vmem:[%s3215_s27 + $0x8] sm:$0xff] (!%p1877_p11), %v1959_v3   ;;  %1999 = vst [vmem:[%s3215_s27 + $0x10] sm:$0xff] (!%p1877_p11), %v1964_v4   ;;  %v1974_v12 = vpack.c.bf16 (!%p1877_p11), %v1545_v9, %v1544_v7  ;;  %v1979_v13 = vpack.c.bf16 (!%p1877_p11), %v1547_v11, %v1546_v10  ;;  %v1548_v14 = vld [vmem:[#allocation3 + $0x60] sm:$0xff] (!%p1877_p11)  ;;  %v1549_v15 = vld [vmem:[#allocation3 + $0x68] sm:$0xff] (!%p1877_p11) }
 0x544   : > { %v1550_v16 = vld [vmem:[#allocation3 + $0x70] sm:$0xff] (!%p1877_p11)  ;;  %2000 = vst [vmem:[%s3215_s27 + $0x18] sm:$0xff] (!%p1877_p11), %v1969_v8   ;;  %v1984_v17 = vpack.c.bf16 (!%p1877_p11), %v1549_v15, %v1548_v14  ;;  %v1551_v18 = vld [vmem:[#allocation3 + $0x78] sm:$0xff] (!%p1877_p11) }
 0x545   : > { %2001 = vst [vmem:[%s3215_s27 + $0x20] sm:$0xff] (!%p1877_p11), %v1974_v12   ;;  %2002 = vst [vmem:[%s3215_s27 + $0x28] sm:$0xff] (!%p1877_p11), %v1979_v13   ;;  %v1989_v19 = vpack.c.bf16 (!%p1877_p11), %v1551_v18, %v1550_v16 }
 0x546   : > { %2003 = vst [vmem:[%s3215_s27 + $0x30] sm:$0xff] (!%p1877_p11), %v1984_v17  }
 0x547   : > { %2004 = vst [vmem:[%s3215_s27 + $0x38] sm:$0xff] %v1989_v19  }
 0x548 PF: > { %s3464_s30 = sld [smem:[#allocation32_spill]]  ;;  %s3465_s15 = sld [smem:[#allocation33_spill]] }
 0x549   : > { %s3466_s29 = sld [smem:[#allocation44_spill]]  ;;  %s1646_s13 = sshll.u32 %s3215_s27, 4  ;;  %s3321_s13 = int_to_ptr.vmem [resolvable:$true] %s1646_s13 }
 0x54a   : > { %s3325_s11 = scalar_lea.sflag [#allocation11], %s459_s1  ;;  %s2643_s28 = scalar_lea.vmem %s3321_s13, 1024 }
 0x54b   : > { %p2644_p2 = scmp.ne.s32.totalorder %s3321_s13, %s2643_s28  ;;  %s2797_s3 = smov [#allocation20]  }
 0x54c   : > { %s2647_s10 = sshll.u32 %s2797_s3, 4  ;;  %s2648_s10 = int_to_ptr.vmem [resolvable:$false] %s2647_s10 }
 0x54d   : > { %s2649_s2 = scalar_lea.vmem %s2648_s10, 2048  ;;  %p2650_p3 = scmp.lt.s32.totalorder %s3321_s13, %s2648_s10 }
 0x54e   : > { %s1918_s24 = sshll.u32 %s3464_s30, 10  ;;  %p3467_p7 = scmp.ne.s32.totalorder %s3465_s15, 0 }
 0x54f   : > { %s3318_s5 = scalar_lea.hbm %s3466_s29, %s1918_s24  ;;  %p2651_p1 = scmp.lt.s32.totalorder %s2649_s2, %s2643_s28 }
 0x550   : > { %p2645_p8 = pnand %p2644_p2, %p3467_p7 }
 0x551   : > { %p2652_p12 = por %p2651_p1, %p2650_p3 }
 0x552   : > { %p2646_p10 = pneg %p2645_p8 }
 0x554   : > { %p2653_p0 = pnand %p2652_p12, %p2646_p10 }
 0x556   : > { %2656 = shalt.err (!%p2653_p0)
}
 0x557   : > { %s2657_s1 = scalar_lea.hbm %s3318_s5, 1024  ;;  %s2661_s17 = scalar_lea.hbm %s3466_s29, 2048 }
 0x558   : > { %p2658_p5 = scmp.ne.s32.totalorder %s3318_s5, %s2657_s1  ;;  %p2662_p6 = scmp.lt.u32.totalorder %s3318_s5, %s3466_s29 }
 0x559   : > { %p2663_p4 = scmp.lt.u32.totalorder %s2661_s17, %s2657_s1  ;;  %p2665_p2 = scmp.lt.u32.totalorder %s2657_s1, %s3318_s5 }
 0x55a   : > { %p2659_p9 = pnand %p2658_p5, %p3467_p7 }
 0x55b   : > { %p2664_p11 = por %p2663_p4, %p2662_p6 }
 0x55c   : > { %p2660_p13 = pneg %p2659_p9 }
 0x55d   : > { %p2666_p8 = por %p2665_p2, %p2664_p11 }
 0x55f   : > { %p2667_p10 = pnand %p2666_p8, %p2660_p13 }
 0x561   : > { %2670 = shalt.err (!%p2667_p10)
}
 0x562   : > { %s2798_s16 = smov 64   ;;  %s2799_s30 = smov 4  }
 0x563   : > { %2253 = dma.vmem_to_hbm [thread:$0]  (%p3467_p7), %s3321_s13, 1024, %s3318_s5, %s3325_s11, %s2798_s16, %s2798_s16, %s2799_s30  }
 0x564 PF: > { %s3468_s24 = sld [smem:[#allocation30_spill]]  ;;  %s3469_s12 = sld [smem:[#allocation34_spill]] }
 0x565   : > { %p2292_p3 = scmp.ge.s32.totalorder %s2783_s0, 2 }
 0x56a   : > { %s1661_s9 = sand.u32 1, %s3468_s24   ;;  %p3470_p1 = scmp.ne.s32.totalorder %s3469_s12, 0 }
 0x56b   : > { %s1662_s28 = scalar_lea.sflag [#allocation11], %s1661_s9 }
 0x56c   : > { %p2278_p12 = pnand %p2292_p3, %p3470_p1 }
 0x56e   : > { %2738 = dma.done.wait (!%p2278_p12), %s1662_s28, 1024  }
 0x56f   : > { %2740 = vsyncadd (!%p2278_p12), %s1662_s28, 4294966272  ;;  %s46_s0 = sadd.s32 1, %s2783_s0   ;;  %s3471_s15 = sld [smem:[#allocation35_spill]] }
 0x570   : > { %p43_p0 = scmp.ge.s32.totalorder %s46_s0, 14   ;;  %s3472_s2 = smov %s2747_s18 }
 0x571   : > { %s3473_s18 = smov %s2751_s19  ;;  %s3474_s19 = smov %s3120_s20 }
 0x572   : > { %s3475_s20 = smov %s2759_s21  ;;  %s3476_s21 = smov %s2763_s22 }
 0x573   : > { %s3477_s22 = smov %s3134_s23  ;;  %s3478_s23 = smov %s2775_s25 }
 0x574   : > { %s3479_s24 = smov %s2779_s26  ;;  %s3480_s25 = smov %s3485_s14 }
 0x575   : > { %s3481_s26 = smov %s3471_s15  ;;  %45 = sbr.rel (!%p43_p0) target bundleno = 56 (0x38), region = 150 }
 0x57c   :  { %1667 = vsyncpa [#allocation10], 1 }
 0x57d   :  { %1669 = vsyncpa [#allocation10 + $0x1], 1 }
 0x57e   :  { %1670 = vsyncpa [#allocation15], 1 }
 0x57f   :  { %1672 = vsyncpa [#allocation15 + $0x1], 1 }
 0x580   :  { %1673 = vsyncpa [#allocation18], 1 }
 0x581   :  { %1674 = vsyncpa [#allocation11], 1 }
 0x582   :  { %1676 = vsyncpa [#allocation11 + $0x1], 1 }
 0x583   :  { %1677 = vsyncpa [#allocation12], 1 }
 0x584   :  { %1679 = vsyncpa [#allocation12 + $0x1], 1 }

</bundles_post_ra>
